<compile_context>
chip_gen: v7x
topology: tpu7x:2x2x1
jax: 0.10.0
libtpu: 0.0.40
codegen_flags: <defaults>
</compile_context>

<pallas_src>
import functools

import jax
import jax.numpy as jnp
import numpy as np
from jax.experimental import pallas as pl
from jax.experimental.pallas import tpu as pltpu  # noqa: F401  (imported for completeness)


def _mul_conv_bn_kernel(x_ref, s_ref, w_ref, g_ref, b_ref, o_ref, *, eps):
    # x_ref: [Cin, P]  bf16 channel-major activations (dominant DMA, halved vs f32)
    # s_ref: [1, Cin]  f32 per-channel multiplier (x244)
    # w_ref: [Cout, Cin] f32 1x1-conv weight
    # g_ref, b_ref: [Cout, 1] f32 batchnorm gamma / beta
    # o_ref: [Cout, P] f32
    #
    # Fold the elementwise scale into the (6x smaller) weight tile instead of the
    # activation tile:  (x*s) @ W^T  ==  (W*s) @ x  in channel-major layout.
    ws = (w_ref[...] * s_ref[...]).astype(jnp.bfloat16)        # [Cout, Cin], bf16 for MXU
    y = jnp.dot(ws, x_ref[...], preferred_element_type=jnp.float32)  # [Cout, P], f32 accumulate

    # BatchNorm2d training-mode batch statistics over (N,H,W) == axis 1.
    # Single pass: var = E[y^2] - mean^2 (biased variance, matches PyTorch).
    mean = jnp.mean(y, axis=1, keepdims=True)                  # [Cout, 1]
    mean_sq = jnp.mean(y * y, axis=1, keepdims=True)           # [Cout, 1]
    var = mean_sq - mean * mean

    # Fold affine into a single per-channel scale/shift -> 2 VPU passes over y.
    a = g_ref[...] * jax.lax.rsqrt(var + eps)                  # [Cout, 1]
    b = b_ref[...] - mean * a                                  # [Cout, 1]
    o_ref[...] = y * a + b


def mul_conv_bn(x_nchw, scale_nc11, weight_oi11, gamma, beta, eps=1e-5):
    N, Cin, H, W = x_nchw.shape
    Cout = weight_oi11.shape[0]
    P = N * H * W

    # Channel-major glue (free metadata reshapes when N == 1; no HBM transposes).
    if N == 1:
        x_cm = x_nchw.reshape(Cin, P)
    else:
        x_cm = jnp.transpose(x_nchw, (1, 0, 2, 3)).reshape(Cin, P)
    # bf16 MXU operands (f32 accumulate); BN statistics stay in f32 inside the kernel.
    x_cm = x_cm.astype(jnp.bfloat16)

    s2d = scale_nc11.reshape(1, Cin)                # f32
    w2d = weight_oi11.reshape(Cout, Cin)            # f32, no transpose needed
    g2d = gamma.reshape(Cout, 1)
    b2d = beta.reshape(Cout, 1)

    # Whole problem (~1 MiB resident) fits a single block -> no grid, no tiling.
    out_cm = pl.pallas_call(
        functools.partial(_mul_conv_bn_kernel, eps=eps),
        out_shape=jax.ShapeDtypeStruct((Cout, P), jnp.float32),
        in_specs=[
            pl.BlockSpec((Cin, P), lambda: (0, 0)),
            pl.BlockSpec((1, Cin), lambda: (0, 0)),
            pl.BlockSpec((Cout, Cin), lambda: (0, 0)),
            pl.BlockSpec((Cout, 1), lambda: (0, 0)),
            pl.BlockSpec((Cout, 1), lambda: (0, 0)),
        ],
        out_specs=pl.BlockSpec((Cout, P), lambda: (0, 0)),
        # No compiler_params: default scoped VMEM is ample; requesting the full
        # 64 MiB (previous version) leaves no headroom on v7x.
    )(x_cm, s2d, w2d, g2d, b2d)

    # Free reshape back to NCHW.
    if N == 1:
        return out_cm.reshape(1, Cout, H, W)
    return jnp.transpose(out_cm.reshape(Cout, N, H, W), (1, 0, 2, 3))


def _reference(x_nchw, scale_nc11, weight_oi11, gamma, beta, eps=1e-5):
    # Pure-f32 reference matching the PyTorch module semantics.
    N, Cin, H, W = x_nchw.shape
    Cout = weight_oi11.shape[0]
    xs = x_nchw * scale_nc11
    x2d = jnp.transpose(xs, (0, 2, 3, 1)).reshape(-1, Cin)
    y2d = x2d @ jnp.transpose(weight_oi11.reshape(Cout, Cin))
    y = jnp.transpose(y2d.reshape(N, H, W, Cout), (0, 3, 1, 2))
    mean = jnp.mean(y, axis=(0, 2, 3), keepdims=True)
    var = jnp.mean((y - mean) ** 2, axis=(0, 2, 3), keepdims=True)
    return (y - mean) / jnp.sqrt(var + eps) * gamma.reshape(1, -1, 1, 1) + beta.reshape(1, -1, 1, 1)


if __name__ == "__main__":
    # Shapes implied by the module: x239 [1,864,14,14], x244 [1,864,1,1], Conv2d(864,144,1).
    N, Cin, H, W, Cout = 1, 864, 14, 14, 144

    key = jax.random.PRNGKey(0)
    k1, k2, k3 = jax.random.split(key, 3)
    x239 = jax.random.normal(k1, (N, Cin, H, W), dtype=jnp.float32)
    x244 = jax.random.normal(k2, (N, Cin, 1, 1), dtype=jnp.float32)

    # Deterministic parameter init (Conv2d(864,144,1,bias=False), BatchNorm2d(144) defaults).
    conv_w = jax.random.normal(k3, (Cout, Cin, 1, 1), dtype=jnp.float32) * 0.02
    bn_gamma = jnp.ones((Cout,), dtype=jnp.float32)
    bn_beta = jnp.zeros((Cout,), dtype=jnp.float32)

    out = mul_conv_bn(x239, x244, conv_w, bn_gamma, bn_beta)
    out = jax.block_until_ready(out)

    ref = jax.block_until_ready(_reference(x239, x244, conv_w, bn_gamma, bn_beta))
    assert out.shape == (N, Cout, H, W)
    # Tolerance accounts for bf16 MXU operands (f32 accumulation); observed error is ~1e-3.
    assert np.allclose(np.asarray(out), np.asarray(ref), atol=2e-2, rtol=2e-2)

    print("KERNEL_OK")
</pallas_src>

<mosaic_0001>
module attributes {stable_mosaic.version = 11 : i64} {
  func.func @_mul_conv_bn_kernel(%arg0: memref<864x196xbf16, #tpu.memory_space<vmem>>, %arg1: memref<1x864xf32, #tpu.memory_space<vmem>>, %arg2: memref<144x864xf32, #tpu.memory_space<vmem>>, %arg3: memref<144x1xf32, #tpu.memory_space<vmem>>, %arg4: memref<144x1xf32, #tpu.memory_space<vmem>>, %arg5: memref<144x196xf32, #tpu.memory_space<vmem>>) attributes {dimension_semantics = [], scalar_prefetch = 0 : i64, scratch_operands = 0 : i64, tpu.core_type = #tpu.core_type<tc>} {
    %c0 = arith.constant 0 : index
    %c0_0 = arith.constant 0 : index
    %0 = vector.load %arg2[%c0, %c0_0] : memref<144x864xf32, #tpu.memory_space<vmem>>, vector<144x864xf32>
    %c0_1 = arith.constant 0 : index
    %c0_2 = arith.constant 0 : index
    %1 = vector.load %arg1[%c0_1, %c0_2] : memref<1x864xf32, #tpu.memory_space<vmem>>, vector<1x864xf32>
    %2 = vector.broadcast %1 : vector<1x864xf32> to vector<144x864xf32>
    %3 = arith.mulf %0, %2 : vector<144x864xf32>
    %4 = arith.truncf %3 : vector<144x864xf32> to vector<144x864xbf16>
    %c0_3 = arith.constant 0 : index
    %c0_4 = arith.constant 0 : index
    %5 = vector.load %arg0[%c0_3, %c0_4] : memref<864x196xbf16, #tpu.memory_space<vmem>>, vector<864x196xbf16>
    %cst = arith.constant dense<0.000000e+00> : vector<144x196xf32>
    %6 = tpu.matmul %4, %5, %cst {dimension_numbers = #tpu.dot_dimension_numbers<[1], [0], [0], [1], [0, 0, 1, 1], [], []>} : vector<144x864xbf16>, vector<864x196xbf16>, vector<144x196xf32> -> vector<144x196xf32>
    %cst_5 = arith.constant dense<0.000000e+00> : vector<144xf32>
    %7 = vector.multi_reduction <add>, %6, %cst_5 [1] : vector<144x196xf32> to vector<144xf32>
    %8 = vector.shape_cast %7 : vector<144xf32> to vector<144x1xf32>
    %cst_6 = arith.constant 1.960000e+02 : f32
    %9 = vector.broadcast %cst_6 : f32 to vector<144x1xf32>
    %10 = arith.divf %8, %9 : vector<144x1xf32>
    %11 = arith.mulf %6, %6 : vector<144x196xf32>
    %cst_7 = arith.constant dense<0.000000e+00> : vector<144xf32>
    %12 = vector.multi_reduction <add>, %11, %cst_7 [1] : vector<144x196xf32> to vector<144xf32>
    %13 = vector.shape_cast %12 : vector<144xf32> to vector<144x1xf32>
    %cst_8 = arith.constant 1.960000e+02 : f32
    %14 = vector.broadcast %cst_8 : f32 to vector<144x1xf32>
    %15 = arith.divf %13, %14 : vector<144x1xf32>
    %16 = arith.mulf %10, %10 : vector<144x1xf32>
    %17 = arith.subf %15, %16 : vector<144x1xf32>
    %c0_9 = arith.constant 0 : index
    %c0_10 = arith.constant 0 : index
    %18 = vector.load %arg3[%c0_9, %c0_10] : memref<144x1xf32, #tpu.memory_space<vmem>>, vector<144x1xf32>
    %cst_11 = arith.constant 9.99999974E-6 : f32
    %19 = vector.broadcast %cst_11 : f32 to vector<144x1xf32>
    %20 = arith.addf %17, %19 : vector<144x1xf32>
    %21 = math.rsqrt %20 : vector<144x1xf32>
    %22 = arith.mulf %18, %21 : vector<144x1xf32>
    %c0_12 = arith.constant 0 : index
    %c0_13 = arith.constant 0 : index
    %23 = vector.load %arg4[%c0_12, %c0_13] : memref<144x1xf32, #tpu.memory_space<vmem>>, vector<144x1xf32>
    %24 = arith.mulf %10, %22 : vector<144x1xf32>
    %25 = arith.subf %23, %24 : vector<144x1xf32>
    %26 = vector.broadcast %22 : vector<144x1xf32> to vector<144x196xf32>
    %27 = arith.mulf %6, %26 : vector<144x196xf32>
    %28 = vector.broadcast %25 : vector<144x1xf32> to vector<144x196xf32>
    %29 = arith.addf %27, %28 : vector<144x196xf32>
    %c0_14 = arith.constant 0 : index
    %c0_15 = arith.constant 0 : index
    %30 = vector.load %arg5[%c0_14, %c0_15] : memref<144x196xf32, #tpu.memory_space<vmem>>, vector<144x196xf32>
    tpu.vector_store %arg5[%c0_14, %c0_15], %29 {strides = array<i32>} : memref<144x196xf32, #tpu.memory_space<vmem>>, vector<144x196xf32>,
    return
  }
}

</mosaic_0001>

<bundles_post_ra>
// kernel: tpu_custom_call.1
= control target key start
LH: loop header
LB: loop body
LE: loop exit
PB: predicated region body
PF: predicated region fallthrough
CT: control target
= control target key end

     0   :  { %v2679_v14 = vmov 0   ;;  %v150_v38 = vlaneseq  ;;  %s4057_s0 = inlined_call_operand.vmem [shape: bf16[864,196], index: 0, kind: input, shape index: {}]   ;;  %s4058_s1 = inlined_call_operand.vmem [shape: f32[1,864], index: 1, kind: input, shape index: {}]   ;;  %s4059_s2 = inlined_call_operand.vmem [shape: f32[144,864], index: 2, kind: input, shape index: {}]   ;;  %s4060_s3 = inlined_call_operand.vmem [shape: f32[144,1], index: 3, kind: input, shape index: {}]   ;;  %s4061_s4 = inlined_call_operand.vmem [shape: f32[144,1], index: 4, kind: input, shape index: {}]   ;;  %s4062_s5 = inlined_call_operand.hbm [shape: f32[144,196], index: 5, kind: output, shape index: {}]  }
   0x1   :  { %v2457_v0 = vld [vmem:[%s4057_s0 + $0x4] ss:$8 sps:$4 sm:$0xff]   ;;  %v2461_v2 = vld [vmem:[%s4057_s0] ss:$8 sps:$4 sm:$0xff]   ;;  %v2463_v4 = vld [vmem:[%s4057_s0 + $0x14] ss:$8 sps:$4 sm:$0xff]   ;;  %2456 = vset.pattern.permute.xlu1 %v2679_v14  ;;  %2455 = vset.pattern.permute.xlu0 %v2679_v14 }
   0x2   :  { %v2459_v1 = vld [vmem:[%s4057_s0 + $0x204] ss:$8 sps:$4 sm:$0xff]   ;;  %1050 = vmatprep.subr.bf16.mxu1 %v2457_v0  ;;  %v2462_v3 = vld [vmem:[%s4057_s0 + $0x200] ss:$8 sps:$4 sm:$0xff]   ;;  %v2465_v5 = vld [vmem:[%s4057_s0 + $0x214] ss:$8 sps:$4 sm:$0xff]  }
   0x3   :  { %1296 = vmatprep.subr.bf16.mxu0 %v2459_v1  ;;  %1051 = vmatpush1.bf16.msra.mxu1 %v2461_v2  ;;  %v2467_v6 = vld [vmem:[%s4057_s0 + $0x10] ss:$8 sps:$4 sm:$0xff]   ;;  %v2469_v8 = vld [vmem:[%s4057_s0 + $0x24] ss:$8 sps:$4 sm:$0xff]   ;;  %v2473_v10 = vld [vmem:[%s4057_s0 + $0x20] ss:$8 sps:$4 sm:$0xff]  }
   0x4   :  { %1297 = vmatpush1.bf16.msra.mxu0 %v2462_v3  ;;  %1052 = vmatprep.subr.bf16.mxu1 %v2463_v4  ;;  %v2468_v7 = vld [vmem:[%s4057_s0 + $0x210] ss:$8 sps:$4 sm:$0xff]   ;;  %v2471_v9 = vld [vmem:[%s4057_s0 + $0x224] ss:$8 sps:$4 sm:$0xff]   ;;  %v2474_v11 = vld [vmem:[%s4057_s0 + $0x220] ss:$8 sps:$4 sm:$0xff]  }
   0x5   :  { %1298 = vmatprep.subr.bf16.mxu0 %v2465_v5  ;;  %v2475_v12 = vld [vmem:[%s4057_s0 + $0x34] ss:$8 sps:$4 sm:$0xff]   ;;  %v2479_v15 = vld [vmem:[%s4057_s0 + $0x30] ss:$8 sps:$4 sm:$0xff]   ;;  %v2481_v17 = vld [vmem:[%s4057_s0 + $0x44] ss:$8 sps:$4 sm:$0xff]  }
   0x6   :  { %v2477_v13 = vld [vmem:[%s4057_s0 + $0x234] ss:$8 sps:$4 sm:$0xff]   ;;  %v2480_v16 = vld [vmem:[%s4057_s0 + $0x230] ss:$8 sps:$4 sm:$0xff]   ;;  %v2483_v18 = vld [vmem:[%s4057_s0 + $0x244] ss:$8 sps:$4 sm:$0xff]  }
   0x7   :  { %1053 = vmatpush1.bf16.msra.mxu1 %v2467_v6  ;;  %v2485_v19 = vld [vmem:[%s4057_s0 + $0x40] ss:$8 sps:$4 sm:$0xff]   ;;  %v2487_v21 = vld [vmem:[%s4057_s0 + $0x54] ss:$8 sps:$4 sm:$0xff]   ;;  %v2491_v23 = vld [vmem:[%s4057_s0 + $0x50] ss:$8 sps:$4 sm:$0xff]  }
   0x8   :  { %1299 = vmatpush1.bf16.msra.mxu0 %v2468_v7  ;;  %1054 = vmatprep.subr.bf16.mxu1 %v2469_v8  ;;  %v2486_v20 = vld [vmem:[%s4057_s0 + $0x240] ss:$8 sps:$4 sm:$0xff]   ;;  %v2489_v22 = vld [vmem:[%s4057_s0 + $0x254] ss:$8 sps:$4 sm:$0xff]   ;;  %v2492_v24 = vld [vmem:[%s4057_s0 + $0x250] ss:$8 sps:$4 sm:$0xff]  }
   0x9   :  { %1300 = vmatprep.subr.bf16.mxu0 %v2471_v9  ;;  %v2493_v25 = vld [vmem:[%s4057_s0 + $0x64] ss:$8 sps:$4 sm:$0xff]   ;;  %v2497_v27 = vld [vmem:[%s4057_s0 + $0x60] ss:$8 sps:$4 sm:$0xff]   ;;  %v2499_v29 = vld [vmem:[%s4057_s0 + $0x74] ss:$8 sps:$4 sm:$0xff]  }
   0xa   :  { %v2495_v26 = vld [vmem:[%s4057_s0 + $0x264] ss:$8 sps:$4 sm:$0xff]   ;;  %v2498_v28 = vld [vmem:[%s4057_s0 + $0x260] ss:$8 sps:$4 sm:$0xff]   ;;  %v2501_v30 = vld [vmem:[%s4057_s0 + $0x274] ss:$8 sps:$4 sm:$0xff]  }
   0xb   :  { %1055 = vmatpush1.bf16.msra.mxu1 %v2473_v10  ;;  %v2503_v31 = vld [vmem:[%s4057_s0 + $0x70] ss:$8 sps:$4 sm:$0xff]   ;;  %v2505_v33 = vld [vmem:[%s4057_s0 + $0x84] ss:$8 sps:$4 sm:$0xff]   ;;  %v2509_v35 = vld [vmem:[%s4057_s0 + $0x80] ss:$8 sps:$4 sm:$0xff]  }
   0xc   :  { %1301 = vmatpush1.bf16.msra.mxu0 %v2474_v11  ;;  %1056 = vmatprep.subr.bf16.mxu1 %v2475_v12  ;;  %v2504_v32 = vld [vmem:[%s4057_s0 + $0x270] ss:$8 sps:$4 sm:$0xff]   ;;  %v2507_v34 = vld [vmem:[%s4057_s0 + $0x284] ss:$8 sps:$4 sm:$0xff]   ;;  %v2510_v36 = vld [vmem:[%s4057_s0 + $0x280] ss:$8 sps:$4 sm:$0xff]  }
   0xd   :  { %1302 = vmatprep.subr.bf16.mxu0 %v2477_v13  ;;  %v2511_v37 = vld [vmem:[%s4057_s0 + $0x94] ss:$8 sps:$4 sm:$0xff]   ;;  %v2515_v40 = vld [vmem:[%s4057_s0 + $0x90] ss:$8 sps:$4 sm:$0xff]   ;;  %v2517_v42 = vld [vmem:[%s4057_s0 + $0xa4] ss:$8 sps:$4 sm:$0xff]  }
   0xe   :  { %v2513_v39 = vld [vmem:[%s4057_s0 + $0x294] ss:$8 sps:$4 sm:$0xff]   ;;  %v2516_v41 = vld [vmem:[%s4057_s0 + $0x290] ss:$8 sps:$4 sm:$0xff]   ;;  %v2838_v43 = vshrl.u32 %v150_v38, 7  ;;  %v23_v54 = vld [vmem:[%s4059_s2 + $0x8] sm:$0xff] }
   0xf   :  { %1057 = vmatpush1.bf16.msra.mxu1 %v2479_v15  ;;  %v2519_v44 = vld [vmem:[%s4057_s0 + $0x2a4] ss:$8 sps:$4 sm:$0xff]   ;;  %v2521_v45 = vld [vmem:[%s4057_s0 + $0xa0] ss:$8 sps:$4 sm:$0xff]   ;;  %v2523_v47 = vld [vmem:[%s4057_s0 + $0xb4] ss:$8 sps:$4 sm:$0xff]  }
  0x10   :  { %1303 = vmatpush1.bf16.msra.mxu0 %v2480_v16  ;;  %1058 = vmatprep.subr.bf16.mxu1 %v2481_v17  ;;  %v2522_v46 = vld [vmem:[%s4057_s0 + $0x2a0] ss:$8 sps:$4 sm:$0xff]   ;;  %v156_v48 = vsub.s32 1, %v2838_v43  ;;  %v172_v49 = vsub.s32 5, %v2838_v43  ;;  %v2525_v50 = vld [vmem:[%s4057_s0 + $0x2b4] ss:$8 sps:$4 sm:$0xff]  }
  0x11   :  { %1304 = vmatprep.subr.bf16.mxu0 %v2483_v18  ;;  %v164_v51 = vsub.s32 3, %v2838_v43  ;;  %v160_v52 = vsub.s32 2, %v2838_v43  ;;  %v2527_v53 = vld [vmem:[%s4057_s0 + $0xb0] ss:$8 sps:$4 sm:$0xff]   ;;  %v30_v55 = vld [vmem:[%s4059_s2 + $0x40] sm:$0xff]  ;;  %v27_v57 = vld [vmem:[%s4059_s2 + $0x28] sm:$0xff] }
  0x12   :  { %v148_v56 = vld [vmem:[%s4058_s1] sm:$0x7f]  ;;  %v2528_v58 = vld [vmem:[%s4057_s0 + $0x2b0] ss:$8 sps:$4 sm:$0xff]   ;;  %v176_v63 = vsub.s32 6, %v2838_v43  ;;  %v152_v16 = vsub.s32 0, %v2838_v43 }
  0x13   :  { %1059 = vmatpush1.bf16.msra.mxu1 %v2485_v19  ;;  %v2529_v59 = vld [vmem:[%s4057_s0 + $0xc4] ss:$8 sps:$4 sm:$0xff]   ;;  %v2880_v60 = vrot.slane %v148_v56, %v156_v48  ;;  %v2885_v62 = vrot.slane %v148_v56, %v172_v49  ;;  %v2891_v1 = vrot.slane %v148_v56, %v164_v51  ;;  %v2893_v2 = vrot.slane %v148_v56, %v160_v52  ;;  %v2533_v7 = vld [vmem:[%s4057_s0 + $0xc0] ss:$8 sps:$4 sm:$0xff]   ;;  %v2535_v12 = vld [vmem:[%s4057_s0 + $0xd4] ss:$8 sps:$4 sm:$0xff]  }
  0x14   :  { %1305 = vmatpush1.bf16.msra.mxu0 %v2486_v20  ;;  %1060 = vmatprep.subr.bf16.mxu1 %v2487_v21  ;;  %v34_v61 = vld [vmem:[%s4059_s2 + $0x60] sm:$0xff]  ;;  %v2905_v11 = vrot.slane %v148_v56, %v176_v63  ;;  %v2537_v13 = vld [vmem:[%s4057_s0 + $0x2d4] ss:$8 sps:$4 sm:$0xff]   ;;  %v2539_v15 = vld [vmem:[%s4057_s0 + $0xd0] ss:$8 sps:$4 sm:$0xff]   ;;  %v168_v17 = vsub.s32 4, %v2838_v43 }
  0x15   :  { %1306 = vmatprep.subr.bf16.mxu0 %v2489_v22  ;;  %v2531_v0 = vld [vmem:[%s4057_s0 + $0x2c4] ss:$8 sps:$4 sm:$0xff]   ;;  %v186_v3 = vmul.f32 %v2880_v60, %v23_v54  ;;  %v193_v4 = vmul.f32 %v2880_v60, %v30_v55  ;;  %v190_v5 = vmul.f32 %v2885_v62, %v27_v57  ;;  %v197_v6 = vmul.f32 %v2885_v62, %v34_v61  ;;  %v2534_v8 = vld [vmem:[%s4057_s0 + $0x2c0] ss:$8 sps:$4 sm:$0xff]   ;;  %v2540_v18 = vld [vmem:[%s4057_s0 + $0x2d0] ss:$8 sps:$4 sm:$0xff]  }
  0x16   :  { %v2541_v19 = vld [vmem:[%s4057_s0 + $0xe4] ss:$8 sps:$4 sm:$0xff]   ;;  %v2545_v21 = vld [vmem:[%s4057_s0 + $0xe0] ss:$8 sps:$4 sm:$0xff]   ;;  %v48_v38 = vld [vmem:[%s4059_s2 + $0xd0] sm:$0xff] }
  0x17   :  { %1061 = vmatpush1.bf16.msra.mxu1 %v2491_v23  ;;  %v312_v9 = vpack.c.bf16 %v193_v4, %v186_v3  ;;  %v316_v10 = vpack.c.bf16 %v197_v6, %v190_v5  ;;  %v2543_v20 = vld [vmem:[%s4057_s0 + $0x2e4] ss:$8 sps:$4 sm:$0xff]   ;;  %v2546_v22 = vld [vmem:[%s4057_s0 + $0x2e0] ss:$8 sps:$4 sm:$0xff]   ;;  %v211_v48 = vmul.f32 %v2885_v62, %v48_v38  ;;  %v36_v49 = vld [vmem:[%s4059_s2 + $0x70] sm:$0xff] }
  0x18   :  { %1307 = vmatpush1.bf16.msra.mxu0 %v2492_v24  ;;  %1062 = vmatprep.subr.bf16.mxu1 %v2493_v25  ;;  %v22_v23 = vld [vmem:[%s4059_s2] sm:$0xff]  ;;  %v2936_v24 = vrot.slane %v148_v56, %v152_v16  ;;  %v2938_v25 = vrot.slane %v148_v56, %v168_v17  ;;  %v2561_v52 = vld [vmem:[%s4057_s0 + $0x114] ss:$8 sps:$4 sm:$0xff]   ;;  %v47_v55 = vld [vmem:[%s4059_s2 + $0xc8] sm:$0xff] }
  0x19   :  { %1308 = vmatprep.subr.bf16.mxu0 %v2495_v26  ;;  %1082 = vmatprep.mubr.bf16.mxu1 %v312_v9  ;;  %v29_v26 = vld [vmem:[%s4059_s2 + $0x38] sm:$0xff]  ;;  %v40_v54 = vld [vmem:[%s4059_s2 + $0x90] sm:$0xff]  ;;  %v62_v3 = vld [vmem:[%s4059_s2 + $0x140] sm:$0xff] }
  0x1a   :  { %1328 = vmatprep.mubr.bf16.mxu0 %v316_v10  ;;  %v2567_v56 = vld [vmem:[%s4057_s0 + $0x314] ss:$8 sps:$4 sm:$0xff]   ;;  %v199_v63 = vmul.f32 %v2936_v24, %v36_v49  ;;  %v203_v5 = vmul.f32 %v2938_v25, %v40_v54  ;;  %v210_v6 = vmul.f32 %v2938_v25, %v47_v55  ;;  %v2565_v9 = vld [vmem:[%s4057_s0 + $0x310] ss:$8 sps:$4 sm:$0xff]   ;;  %v2579_v16 = vld [vmem:[%s4057_s0 + $0x324] ss:$8 sps:$4 sm:$0xff]  }
  0x1b   :  { %1063 = vmatpush1.bf16.msra.mxu1 %v2497_v27  ;;  %v26_v27 = vld [vmem:[%s4059_s2 + $0x20] sm:$0xff]  ;;  %v2591_v38 = vld [vmem:[%s4057_s0 + $0x334] ss:$8 sps:$4 sm:$0xff]   ;;  %v75_v54 = vld [vmem:[%s4059_s2 + $0x1a8] sm:$0xff] }
  0x1c   :  { %1309 = vmatpush1.bf16.msra.mxu0 %v2498_v28  ;;  %1064 = vmatprep.subr.bf16.mxu1 %v2499_v29  ;;  %v33_v28 = vld [vmem:[%s4059_s2 + $0x58] sm:$0xff]  ;;  %v2562_v17 = vld [vmem:[%s4057_s0 + $0x120] ss:$8 sps:$4 sm:$0xff]  }
  0x1d   :  { %1310 = vmatprep.subr.bf16.mxu0 %v2501_v30  ;;  %v2547_v29 = vld [vmem:[%s4057_s0 + $0xf4] ss:$8 sps:$4 sm:$0xff]   ;;  %v79_v55 = vld [vmem:[%s4059_s2 + $0x1c8] sm:$0xff] }
  0x1e   :  { %v2549_v30 = vld [vmem:[%s4057_s0 + $0x2f4] ss:$8 sps:$4 sm:$0xff]  }
  0x1f   :  { %1065 = vmatpush1.bf16.msra.mxu1 %v2503_v31  ;;  %v37_v31 = vld [vmem:[%s4059_s2 + $0x78] sm:$0xff] }
  0x20   :  { %1311 = vmatpush1.bf16.msra.mxu0 %v2504_v32  ;;  %1066 = vmatprep.subr.bf16.mxu1 %v2505_v33  ;;  %v44_v32 = vld [vmem:[%s4059_s2 + $0xb0] sm:$0xff]  ;;  %v41_v33 = vld [vmem:[%s4059_s2 + $0x98] sm:$0xff]  ;;  %v200_v43 = vmul.f32 %v2880_v60, %v37_v31 }
  0x21   :  { %1312 = vmatprep.subr.bf16.mxu0 %v2507_v34  ;;  %v185_v34 = vmul.f32 %v2936_v24, %v22_v23  ;;  %v2576_v49 = vld [vmem:[%s4057_s0 + $0x154] ss:$8 sps:$4 sm:$0xff]  }
  0x23   :  { %1067 = vmatpush1.bf16.msra.mxu1 %v2509_v35  ;;  %v192_v35 = vmul.f32 %v2936_v24, %v29_v26  ;;  %v61_v26 = vld [vmem:[%s4059_s2 + $0x138] sm:$0xff] }
  0x24   :  { %1313 = vmatpush1.bf16.msra.mxu0 %v2510_v36  ;;  %1068 = vmatprep.subr.bf16.mxu1 %v2511_v37  ;;  %v189_v36 = vmul.f32 %v2938_v25, %v26_v27  ;;  %v196_v37 = vmul.f32 %v2938_v25, %v33_v28  ;;  %v2570_v27 = vld [vmem:[%s4057_s0 + $0x134] ss:$8 sps:$4 sm:$0xff]  }
  0x25   :  { %1314 = vmatprep.subr.bf16.mxu0 %v2513_v39  ;;  %v2551_v39 = vld [vmem:[%s4057_s0 + $0xf0] ss:$8 sps:$4 sm:$0xff]  }
  0x26   :  { %v315_v51 = vpack.c.bf16 %v196_v37, %v189_v36  ;;  %v224_v37 = vmul.f32 %v2938_v25, %v61_v26 }
  0x27   :  { %1069 = vmatpush1.bf16.msra.mxu1 %v2515_v40  ;;  %v2552_v40 = vld [vmem:[%s4057_s0 + $0x2f0] ss:$8 sps:$4 sm:$0xff]  }
  0x28   :  { %1315 = vmatpush1.bf16.msra.mxu0 %v2516_v41  ;;  %1070 = vmatprep.subr.bf16.mxu1 %v2517_v42  ;;  %v2555_v41 = vld [vmem:[%s4057_s0 + $0x104] ss:$8 sps:$4 sm:$0xff]  }
  0x29   :  { %1316 = vmatprep.subr.bf16.mxu0 %v2519_v44  ;;  %v2558_v42 = vld [vmem:[%s4057_s0 + $0x304] ss:$8 sps:$4 sm:$0xff]   ;;  %v207_v44 = vmul.f32 %v2880_v60, %v44_v32  ;;  %v69_v32 = vld [vmem:[%s4059_s2 + $0x178] sm:$0xff] }
  0x2b   :  { %1071 = vmatpush1.bf16.msra.mxu1 %v2521_v45  ;;  %v2553_v45 = vld [vmem:[%s4057_s0 + $0x100] ss:$8 sps:$4 sm:$0xff]   ;;  %v319_v57 = vpack.c.bf16 %v207_v44, %v200_v43  ;;  %v232_v43 = vmul.f32 %v2885_v62, %v69_v32 }
  0x2c   :  { %1317 = vmatpush1.bf16.msra.mxu0 %v2522_v46  ;;  %1072 = vmatprep.subr.bf16.mxu1 %v2523_v47  ;;  %v2556_v46 = vld [vmem:[%s4057_s0 + $0x300] ss:$8 sps:$4 sm:$0xff]   ;;  %v204_v47 = vmul.f32 %v2885_v62, %v41_v33  ;;  %v76_v33 = vld [vmem:[%s4059_s2 + $0x1b0] sm:$0xff] }
  0x2d   :  { %1318 = vmatprep.subr.bf16.mxu0 %v2525_v50  ;;  %v311_v50 = vpack.c.bf16 %v192_v35, %v185_v34  ;;  %v2577_v34 = vld [vmem:[%s4057_s0 + $0x320] ss:$8 sps:$4 sm:$0xff]   ;;  %v239_v44 = vmul.f32 %v2885_v62, %v76_v33 }
  0x2e   :  { %v323_v61 = vpack.c.bf16 %v211_v48, %v204_v47 }
  0x2f   :  { %1073 = vmatpush1.bf16.msra.mxu1 %v2527_v53  ;;  %v43_v53 = vld [vmem:[%s4059_s2 + $0xa8] sm:$0xff] }
  0x30   :  { %1319 = vmatpush1.bf16.msra.mxu0 %v2528_v58  ;;  %1074 = vmatprep.subr.bf16.mxu1 %v2529_v59  ;;  %v51_v58 = vld [vmem:[%s4059_s2 + $0xe8] sm:$0xff]  ;;  %v58_v59 = vld [vmem:[%s4059_s2 + $0x120] sm:$0xff]  ;;  %v206_v4 = vmul.f32 %v2936_v24, %v43_v53  ;;  %v68_v53 = vld [vmem:[%s4059_s2 + $0x170] sm:$0xff] }
  0x31   :  { %1320 = vmatprep.subr.bf16.mxu0 %v2531_v0  ;;  %v55_v0 = vld [vmem:[%s4059_s2 + $0x108] sm:$0xff]  ;;  %v214_v10 = vmul.f32 %v2880_v60, %v51_v58 }
  0x32   :  { %v83_v58 = vld [vmem:[%s4059_s2 + $0x1e8] sm:$0xff] }
  0x33   :  { %1075 = vmatpush1.bf16.msra.mxu1 %v2533_v7  ;;  %v2559_v7 = vld [vmem:[%s4057_s0 + $0x110] ss:$8 sps:$4 sm:$0xff]  }
  0x34   :  { %1321 = vmatpush1.bf16.msra.mxu0 %v2534_v8  ;;  %1076 = vmatprep.subr.bf16.mxu1 %v2535_v12  ;;  %v2564_v8 = vld [vmem:[%s4057_s0 + $0x124] ss:$8 sps:$4 sm:$0xff]   ;;  %v221_v12 = vmul.f32 %v2880_v60, %v58_v59 }
  0x35   :  { %1322 = vmatprep.subr.bf16.mxu0 %v2537_v13  ;;  %v218_v13 = vmul.f32 %v2885_v62, %v55_v0 }
  0x36   :  { %v326_v23 = vpack.c.bf16 %v221_v12, %v214_v10  ;;  %v246_v10 = vmul.f32 %v2885_v62, %v83_v58 }
  0x37   :  { %1077 = vmatpush1.bf16.msra.mxu1 %v2539_v15  ;;  %v225_v15 = vmul.f32 %v2885_v62, %v62_v3  ;;  %v231_v3 = vmul.f32 %v2938_v25, %v68_v53  ;;  %v114_v53 = vld [vmem:[%s4059_s2 + $0x2e0] sm:$0xff] }
  0x38   :  { %1323 = vmatpush1.bf16.msra.mxu0 %v2540_v18  ;;  %1078 = vmatprep.subr.bf16.mxu1 %v2541_v19  ;;  %v50_v18 = vld [vmem:[%s4059_s2 + $0xe0] sm:$0xff]  ;;  %v57_v19 = vld [vmem:[%s4059_s2 + $0x118] sm:$0xff] }
  0x39   :  { %1324 = vmatprep.subr.bf16.mxu0 %v2543_v20  ;;  %v318_v20 = vpack.c.bf16 %v206_v4, %v199_v63  ;;  %v330_v28 = vpack.c.bf16 %v225_v15, %v218_v13  ;;  %v213_v31 = vmul.f32 %v2936_v24, %v50_v18  ;;  %v220_v35 = vmul.f32 %v2936_v24, %v57_v19  ;;  %v2600_v63 = vld [vmem:[%s4057_s0 + $0x344] ss:$8 sps:$4 sm:$0xff]   ;;  %v2580_v13 = vld [vmem:[%s4057_s0 + $0x160] ss:$8 sps:$4 sm:$0xff]   ;;  %v2585_v19 = vld [vmem:[%s4057_s0 + $0x174] ss:$8 sps:$4 sm:$0xff]  }
  0x3a   :  { %v238_v4 = vmul.f32 %v2938_v25, %v75_v54  ;;  %v78_v15 = vld [vmem:[%s4059_s2 + $0x1c0] sm:$0xff] }
  0x3b   :  { %1079 = vmatpush1.bf16.msra.mxu1 %v2545_v21  ;;  %v322_v21 = vpack.c.bf16 %v210_v6, %v203_v5  ;;  %v325_v47 = vpack.c.bf16 %v220_v35, %v213_v31  ;;  %v2598_v5 = vld [vmem:[%s4057_s0 + $0x340] ss:$8 sps:$4 sm:$0xff]   ;;  %v2574_v6 = vld [vmem:[%s4057_s0 + $0x150] ss:$8 sps:$4 sm:$0xff]   ;;  %v2612_v31 = vld [vmem:[%s4057_s0 + $0x354] ss:$8 sps:$4 sm:$0xff]  }
  0x3c   :  { %1325 = vmatpush1.bf16.msra.mxu0 %v2546_v22  ;;  %1080 = vmatprep.subr.bf16.mxu1 %v2547_v29  ;;  %v54_v22 = vld [vmem:[%s4059_s2 + $0x100] sm:$0xff]  ;;  %v65_v29 = vld [vmem:[%s4059_s2 + $0x158] sm:$0xff]  ;;  %v336_v18 = vpack.c.bf16 %v238_v4, %v231_v3 }
  0x3d   :  { %1326 = vmatprep.subr.bf16.mxu0 %v2549_v30  ;;  %v72_v30 = vld [vmem:[%s4059_s2 + $0x190] sm:$0xff]  ;;  %v217_v36 = vmul.f32 %v2938_v25, %v54_v22  ;;  %v2597_v3 = vld [vmem:[%s4057_s0 + $0x1a4] ss:$8 sps:$4 sm:$0xff]  }
  0x3e   :  { %v2610_v35 = vld [vmem:[%s4057_s0 + $0x350] ss:$8 sps:$4 sm:$0xff]  }
  0x3f   :  { %1081 = vmatpush1.bf16.msra.mxu1 %v2551_v39  ;;  %v2568_v39 = vld [vmem:[%s4057_s0 + $0x130] ss:$8 sps:$4 sm:$0xff]   ;;  %v329_v48 = vpack.c.bf16 %v224_v37, %v217_v36 }
  0x40   :  { %1327 = vmatpush1.bf16.msra.mxu0 %v2552_v40  ;;  %1173 = vmatprep.subr.bf16.mxu1 %v2555_v41  ;;  %v228_v40 = vmul.f32 %v2880_v60, %v65_v29  ;;  %v235_v41 = vmul.f32 %v2880_v60, %v72_v30  ;;  %v241_v29 = vmul.f32 %v2936_v24, %v78_v15  ;;  %v104_v30 = vld [vmem:[%s4059_s2 + $0x290] sm:$0xff]  ;;  %v117_v15 = vld [vmem:[%s4059_s2 + $0x2f8] sm:$0xff] }
  0x41   :  { %1419 = vmatprep.subr.bf16.mxu0 %v2558_v42  ;;  %v2573_v42 = vld [vmem:[%s4057_s0 + $0x144] ss:$8 sps:$4 sm:$0xff]   ;;  %v2583_v36 = vld [vmem:[%s4057_s0 + $0x170] ss:$8 sps:$4 sm:$0xff]  }
  0x42   :  { %1083 = vmatmul.mubr.bf16.vlgmr.msra.gmra.mrb[0].mxu1 %v311_v50  ;;  %v64_v50 = vld [vmem:[%s4059_s2 + $0x150] sm:$0xff] }
  0x43   :  { %1329 = vmatmul.mubr.bf16.vlgmr.msra.gmra.mrb[0].mxu0 %v315_v51  ;;  %1174 = vmatpush1.bf16.msra.mxu1 %v2553_v45  ;;  %v2571_v45 = vld [vmem:[%s4057_s0 + $0x140] ss:$8 sps:$4 sm:$0xff]   ;;  %v227_v59 = vmul.f32 %v2936_v24, %v64_v50 }
  0x44   :  { %1420 = vmatpush1.bf16.msra.mxu0 %v2556_v46  ;;  %1175 = vmatprep.subr.bf16.mxu1 %v2561_v52  ;;  %v2589_v46 = vld [vmem:[%s4057_s0 + $0x330] ss:$8 sps:$4 sm:$0xff]   ;;  %v71_v51 = vld [vmem:[%s4059_s2 + $0x188] sm:$0xff]  ;;  %v333_v52 = vpack.c.bf16 %v235_v41, %v228_v40  ;;  %v267_v41 = vmul.f32 %v2885_v62, %v104_v30 }
  0x45   :  { %1092 = vmatprep.mubr.bf16.mxu1 %v319_v57  ;;  %1338 = vmatprep.mubr.bf16.mxu0 %v323_v61  ;;  %v86_v57 = vld [vmem:[%s4059_s2 + $0x200] sm:$0xff]  ;;  %v234_v0 = vmul.f32 %v2936_v24, %v71_v51  ;;  %v2594_v51 = vld [vmem:[%s4057_s0 + $0x194] ss:$8 sps:$4 sm:$0xff]  }
  0x46   :  { %1421 = vmatprep.subr.bf16.mxu0 %v2567_v56  ;;  %v337_v56 = vpack.c.bf16 %v239_v44, %v232_v43  ;;  %v90_v61 = vld [vmem:[%s4059_s2 + $0x220] sm:$0xff] }
  0x47   :  { %1176 = vmatpush1.bf16.msra.mxu1 %v2559_v7  ;;  %v242_v7 = vmul.f32 %v2880_v60, %v79_v55  ;;  %v253_v12 = vmul.f32 %v2885_v62, %v90_v61  ;;  %v111_v55 = vld [vmem:[%s4059_s2 + $0x2c8] sm:$0xff]  ;;  %v2592_v61 = vld [vmem:[%s4057_s0 + $0x190] ss:$8 sps:$4 sm:$0xff]  }
  0x48   :  { %1422 = vmatpush1.bf16.msra.mxu0 %v2565_v9  ;;  %1177 = vmatprep.subr.bf16.mxu1 %v2564_v8  ;;  %v249_v8 = vmul.f32 %v2880_v60, %v86_v57  ;;  %v2582_v9 = vld [vmem:[%s4057_s0 + $0x164] ss:$8 sps:$4 sm:$0xff]   ;;  %v274_v4 = vmul.f32 %v2885_v62, %v111_v55 }
  0x49   :  { %1423 = vmatprep.subr.bf16.mxu0 %v2579_v16  ;;  %v85_v16 = vld [vmem:[%s4059_s2 + $0x1f8] sm:$0xff]  ;;  %v344_v26 = vpack.c.bf16 %v253_v12, %v246_v10 }
  0x4a   :  { %1093 = vmatmul.mubr.bf16.gmra.mrb[4].mxu1 %v318_v20  ;;  %v82_v20 = vld [vmem:[%s4059_s2 + $0x1e0] sm:$0xff]  ;;  %v340_v22 = vpack.c.bf16 %v249_v8, %v242_v7  ;;  %v248_v32 = vmul.f32 %v2936_v24, %v85_v16  ;;  %v113_v12 = vld [vmem:[%s4059_s2 + $0x2d8] sm:$0xff] }
  0x4b   :  { %1339 = vmatmul.mubr.bf16.gmra.mrb[4].mxu0 %v322_v21  ;;  %1178 = vmatpush1.bf16.msra.mxu1 %v2562_v17  ;;  %v332_v17 = vpack.c.bf16 %v234_v0, %v227_v59  ;;  %v89_v21 = vld [vmem:[%s4059_s2 + $0x218] sm:$0xff]  ;;  %v245_v33 = vmul.f32 %v2938_v25, %v82_v20  ;;  %v277_v0 = vmul.f32 %v2880_v60, %v114_v53  ;;  %v2595_v8 = vld [vmem:[%s4057_s0 + $0x1a0] ss:$8 sps:$4 sm:$0xff]  }
  0x4c   :  { %1102 = vmatprep.mubr.bf16.mxu1 %v326_v23  ;;  %1179 = vmatprep.subr.bf16.mxu1 %v2570_v27  ;;  %v93_v23 = vld [vmem:[%s4059_s2 + $0x238] sm:$0xff]  ;;  %v100_v27 = vld [vmem:[%s4059_s2 + $0x270] sm:$0xff]  ;;  %v339_v43 = vpack.c.bf16 %v248_v32, %v241_v29 }
  0x4d   :  { %1348 = vmatprep.mubr.bf16.mxu0 %v330_v28  ;;  %1424 = vmatpush1.bf16.msra.mxu0 %v2577_v34  ;;  %v97_v28 = vld [vmem:[%s4059_s2 + $0x258] sm:$0xff]  ;;  %v252_v34 = vmul.f32 %v2938_v25, %v89_v21  ;;  %v256_v37 = vmul.f32 %v2880_v60, %v93_v23  ;;  %v276_v23 = vmul.f32 %v2936_v24, %v113_v12 }
  0x4e   :  { %1425 = vmatprep.subr.bf16.mxu0 %v2591_v38  ;;  %v263_v38 = vmul.f32 %v2880_v60, %v100_v27  ;;  %v260_v40 = vmul.f32 %v2885_v62, %v97_v28  ;;  %v125_v21 = vld [vmem:[%s4059_s2 + $0x338] sm:$0xff]  ;;  %v280_v27 = vmul.f32 %v2938_v25, %v117_v15 }
  0x4f   :  { %1180 = vmatpush1.bf16.msra.mxu1 %v2568_v39  ;;  %v2588_v39 = vld [vmem:[%s4057_s0 + $0x184] ss:$8 sps:$4 sm:$0xff]   ;;  %v343_v44 = vpack.c.bf16 %v252_v34, %v245_v33  ;;  %v2601_v28 = vld [vmem:[%s4057_s0 + $0x1b0] ss:$8 sps:$4 sm:$0xff]   ;;  %v288_v32 = vmul.f32 %v2885_v62, %v125_v21  ;;  %v2604_v34 = vld [vmem:[%s4057_s0 + $0x1c0] ss:$8 sps:$4 sm:$0xff]  }
  0x50   :  { %1181 = vmatprep.subr.bf16.mxu1 %v2573_v42  ;;  %v2586_v42 = vld [vmem:[%s4057_s0 + $0x180] ss:$8 sps:$4 sm:$0xff]   ;;  %v351_v50 = vpack.c.bf16 %v267_v41, %v260_v40 }
  0x51   :  { %1426 = vmatpush1.bf16.msra.mxu0 %v2589_v46  ;;  %v347_v46 = vpack.c.bf16 %v263_v38, %v256_v37  ;;  %v120_v37 = vld [vmem:[%s4059_s2 + $0x310] sm:$0xff]  ;;  %v127_v38 = vld [vmem:[%s4059_s2 + $0x348] sm:$0xff] }
  0x52   :  { %1103 = vmatmul.mubr.bf16.gmra.mrb[8].mxu1 %v325_v47  ;;  %1427 = vmatprep.subr.bf16.mxu0 %v2600_v63  ;;  %v99_v47 = vld [vmem:[%s4059_s2 + $0x268] sm:$0xff] }
  0x53   :  { %1349 = vmatmul.mubr.bf16.gmra.mrb[8].mxu0 %v329_v48  ;;  %1182 = vmatpush1.bf16.msra.mxu1 %v2571_v45  ;;  %v92_v45 = vld [vmem:[%s4059_s2 + $0x230] sm:$0xff]  ;;  %v262_v57 = vmul.f32 %v2936_v24, %v99_v47  ;;  %v131_v41 = vld [vmem:[%s4059_s2 + $0x368] sm:$0xff]  ;;  %v146_v47 = vld [vmem:[%s4059_s2 + $0x3e0] sm:$0xff] }
  0x54   :  { %1112 = vmatprep.mubr.bf16.mxu1 %v333_v52  ;;  %1183 = vmatprep.subr.bf16.mxu1 %v2576_v49  ;;  %v96_v48 = vld [vmem:[%s4059_s2 + $0x250] sm:$0xff]  ;;  %v103_v49 = vld [vmem:[%s4059_s2 + $0x288] sm:$0xff]  ;;  %v255_v54 = vmul.f32 %v2936_v24, %v92_v45  ;;  %v142_v45 = vld [vmem:[%s4059_s2 + $0x3c0] sm:$0xff] }
  0x55   :  { %1358 = vmatprep.mubr.bf16.mxu0 %v337_v56  ;;  %1428 = vmatpush1.bf16.msra.mxu0 %v2598_v5  ;;  %v107_v52 = vld [vmem:[%s4059_s2 + $0x2a8] sm:$0xff]  ;;  %v118_v56 = vld [vmem:[%s4059_s2 + $0x300] sm:$0xff]  ;;  %v259_v58 = vmul.f32 %v2938_v25, %v96_v48  ;;  %v266_v59 = vmul.f32 %v2938_v25, %v103_v49  ;;  %v283_v48 = vmul.f32 %v2936_v24, %v120_v37 }
  0x56   :  { %1429 = vmatprep.subr.bf16.mxu0 %v2612_v31  ;;  %v270_v63 = vmul.f32 %v2880_v60, %v107_v52  ;;  %v281_v5 = vmul.f32 %v2885_v62, %v118_v56  ;;  %v2606_v31 = vld [vmem:[%s4057_s0 + $0x1c4] ss:$8 sps:$4 sm:$0xff]   ;;  %v290_v49 = vmul.f32 %v2936_v24, %v127_v38 }
  0x57   :  { %1184 = vmatpush1.bf16.msra.mxu1 %v2574_v6  ;;  %v346_v6 = vpack.c.bf16 %v262_v57, %v255_v54  ;;  %v350_v7 = vpack.c.bf16 %v266_v59, %v259_v58 }
  0x58   :  { %1185 = vmatprep.subr.bf16.mxu1 %v2582_v9  ;;  %v106_v9 = vld [vmem:[%s4059_s2 + $0x2a0] sm:$0xff]  ;;  %v354_v10 = vpack.c.bf16 %v277_v0, %v270_v63  ;;  %v358_v16 = vpack.c.bf16 %v281_v5, %v274_v4 }
  0x59   :  { %1430 = vmatpush1.bf16.msra.mxu0 %v2610_v35  ;;  %v269_v20 = vmul.f32 %v2936_v24, %v106_v9 }
  0x5a   :  { %1113 = vmatmul.mubr.bf16.gmra.mrb[12].mxu1 %v332_v17  ;;  %v2603_v17 = vld [vmem:[%s4057_s0 + $0x1b4] ss:$8 sps:$4 sm:$0xff]  }
  0x5b   :  { %1359 = vmatmul.mubr.bf16.gmra.mrb[12].mxu0 %v336_v18  ;;  %1186 = vmatpush1.bf16.msra.mxu1 %v2580_v13  ;;  %v110_v13 = vld [vmem:[%s4059_s2 + $0x2c0] sm:$0xff]  ;;  %v121_v18 = vld [vmem:[%s4059_s2 + $0x318] sm:$0xff]  ;;  %v353_v35 = vpack.c.bf16 %v276_v23, %v269_v20 }
  0x5c   :  { %1122 = vmatprep.mubr.bf16.mxu1 %v340_v22  ;;  %1368 = vmatprep.mubr.bf16.mxu0 %v344_v26  ;;  %v132_v22 = vld [vmem:[%s4059_s2 + $0x370] sm:$0xff]  ;;  %v273_v26 = vmul.f32 %v2938_v25, %v110_v13  ;;  %v284_v29 = vmul.f32 %v2880_v60, %v121_v18 }
  0x5d   :  { %1187 = vmatprep.subr.bf16.mxu1 %v2585_v19  ;;  %v128_v19 = vld [vmem:[%s4059_s2 + $0x350] sm:$0xff]  ;;  %v295_v33 = vmul.f32 %v2885_v62, %v132_v22 }
  0x5e   :  { %v291_v30 = vmul.f32 %v2880_v60, %v128_v19 }
  0x5f   :  { %1188 = vmatpush1.bf16.msra.mxu1 %v2583_v36  ;;  %v357_v36 = vpack.c.bf16 %v280_v27, %v273_v26 }
  0x60   :  { %1189 = vmatprep.subr.bf16.mxu1 %v2588_v39  ;;  %v124_v39 = vld [vmem:[%s4059_s2 + $0x330] sm:$0xff]  ;;  %v361_v40 = vpack.c.bf16 %v291_v30, %v284_v29 }
  0x62   :  { %1123 = vmatmul.mubr.bf16.gmra.mrb[16].mxu1 %v339_v43  ;;  %v135_v43 = vld [vmem:[%s4059_s2 + $0x388] sm:$0xff] }
  0x63   :  { %1369 = vmatmul.mubr.bf16.gmra.mrb[16].mxu0 %v343_v44  ;;  %1190 = vmatpush1.bf16.msra.mxu1 %v2586_v42  ;;  %v2609_v42 = vld [vmem:[%s4057_s0 + $0x1d4] ss:$8 sps:$4 sm:$0xff]   ;;  %v365_v44 = vpack.c.bf16 %v295_v33, %v288_v32 }
  0x64   :  { %1132 = vmatprep.mubr.bf16.mxu1 %v347_v46  ;;  %1378 = vmatprep.mubr.bf16.mxu0 %v351_v50  ;;  %v139_v46 = vld [vmem:[%s4059_s2 + $0x3a8] sm:$0xff] }
  0x65   :  { %1191 = vmatprep.subr.bf16.mxu1 %v2594_v51 }
  0x67   :  { %1192 = vmatpush1.bf16.msra.mxu1 %v2592_v61 }
  0x68   :  { %1193 = vmatprep.subr.bf16.mxu1 %v2597_v3 }
  0x6a   :  { %1133 = vmatmul.mubr.bf16.gmra.mrb[20].mxu1 %v346_v6 }
  0x6b   :  { %1379 = vmatmul.mubr.bf16.gmra.mrb[20].mxu0 %v350_v7  ;;  %1194 = vmatpush1.bf16.msra.mxu1 %v2595_v8 }
  0x6c   :  { %1142 = vmatprep.mubr.bf16.mxu1 %v354_v10  ;;  %1388 = vmatprep.mubr.bf16.mxu0 %v358_v16 }
  0x6d   :  { %1195 = vmatprep.subr.bf16.mxu1 %v2603_v17 }
  0x6f   :  { %1196 = vmatpush1.bf16.msra.mxu1 %v2601_v28 }
  0x70   :  { %1197 = vmatprep.subr.bf16.mxu1 %v2606_v31 }
  0x71   :  { %10 = vsyncpa [#allocation3], 0  ;;  %v287_v50 = vmul.f32 %v2938_v25, %v124_v39  ;;  %v294_v51 = vmul.f32 %v2938_v25, %v131_v41  ;;  %v298_v52 = vmul.f32 %v2880_v60, %v135_v43  ;;  %v2607_v53 = vld [vmem:[%s4057_s0 + $0x1d0] ss:$8 sps:$4 sm:$0xff]   ;;  %v305_v54 = vmul.f32 %v2880_v60, %v142_v45  ;;  %v2615_v57 = vld [vmem:[%s4057_s0 + $0x1e4] ss:$8 sps:$4 sm:$0xff]  }
  0x72   :  { %1143 = vmatmul.mubr.bf16.gmra.mrb[24].mxu1 %v353_v35  ;;  %v302_v55 = vmul.f32 %v2885_v62, %v139_v46  ;;  %v309_v56 = vmul.f32 %v2885_v62, %v146_v47  ;;  %v360_v58 = vpack.c.bf16 %v290_v49, %v283_v48  ;;  %v134_v61 = vld [vmem:[%s4059_s2 + $0x380] sm:$0xff]  ;;  %v141_v60 = vld [vmem:[%s4059_s2 + $0x3b8] sm:$0xff]  ;;  %v32_v6 = vld [vmem:[%s4059_s2 + $0x50] sm:$0xff]  ;;  %vm1022_vm0 = vcmask 785408  }
  0x73   :  { %1389 = vmatmul.mubr.bf16.gmra.mrb[24].mxu0 %v357_v36  ;;  %1152 = vmatprep.mubr.bf16.mxu1 %v361_v40  ;;  %v364_v59 = vpack.c.bf16 %v294_v51, %v287_v50  ;;  %v368_v63 = vpack.c.bf16 %v305_v54, %v298_v52  ;;  %v138_v62 = vld [vmem:[%s4059_s2 + $0x3a0] sm:$0xff]  ;;  %v145_v3 = vld [vmem:[%s4059_s2 + $0x3d8] sm:$0xff]  ;;  %v297_v7 = vmul.f32 %v2936_v24, %v134_v61  ;;  %v28_v20 = vld [vmem:[%s4059_s2 + $0x30] sm:$0xff]  ;;  %vm1542_vm1 = vcmask 556032  }
  0x74   :  { %1198 = vmatpush1.bf16.msra.mxu1 %v2604_v34  ;;  %1398 = vmatprep.mubr.bf16.mxu0 %v365_v44  ;;  %v372_v0 = vpack.c.bf16 %v309_v56, %v302_v55  ;;  %v2613_v4 = vld [vmem:[%s4057_s0 + $0x1e0] ss:$8 sps:$4 sm:$0xff]   ;;  %v25_v5 = vld [vmem:[%s4059_s2 + $0x18] sm:$0xff]  ;;  %v304_v9 = vmul.f32 %v2936_v24, %v141_v60  ;;  %v301_v10 = vmul.f32 %v2938_v25, %v138_v62  ;;  %v24_v24 = vld [vmem:[%s4059_s2 + $0x10] sm:$0xff] }
  0x75   :  { %1199 = vmatprep.subr.bf16.mxu1 %v2609_v42  ;;  %v2618_v8 = vld [vmem:[%s4057_s0 + $0x1f4] ss:$8 sps:$4 sm:$0xff]   ;;  %v308_v12 = vmul.f32 %v2938_v25, %v145_v3  ;;  %v188_v13 = vmul.f32 %v2891_v1, %v25_v5  ;;  %v195_v15 = vmul.f32 %v2891_v1, %v32_v6  ;;  %v2616_v16 = vld [vmem:[%s4057_s0 + $0x1f0] ss:$8 sps:$4 sm:$0xff]   ;;  %v31_v25 = vld [vmem:[%s4059_s2 + $0x48] sm:$0xff]  ;;  %v187_v26 = vmul.f32 %v2893_v2, %v24_v24 }
  0x76   :  { %v367_v17 = vpack.c.bf16 %v304_v9, %v297_v7  ;;  %v35_v21 = vld [vmem:[%s4059_s2 + $0x68] sm:$0xff]  ;;  %v46_v23 = vld [vmem:[%s4059_s2 + $0xc0] sm:$0xff]  ;;  %v194_v27 = vmul.f32 %v2893_v2, %v31_v25  ;;  %v191_v28 = vmul.f32 %v2905_v11, %v28_v20  ;;  %v45_v36 = vld [vmem:[%s4059_s2 + $0xb8] sm:$0xff] }
  0x77   :  { %v371_v18 = vpack.c.bf16 %v308_v12, %v301_v10  ;;  %v314_v19 = vpack.c.bf16 %v195_v15, %v188_v13  ;;  %v39_v22 = vld [vmem:[%s4059_s2 + $0x88] sm:$0xff]  ;;  %v198_v29 = vmul.f32 %v2905_v11, %v35_v21  ;;  %v209_v31 = vmul.f32 %v2891_v1, %v46_v23  ;;  %v38_v34 = vld [vmem:[%s4059_s2 + $0x80] sm:$0xff]  ;;  %v49_v38 = vld [vmem:[%s4059_s2 + $0xd8] sm:$0xff] }
  0x78   :  { %1200 = vmatpush1.bf16.msra.mxu1 %v2607_v53  ;;  %v202_v30 = vmul.f32 %v2891_v1, %v39_v22  ;;  %v313_v32 = vpack.c.bf16 %v194_v27, %v187_v26  ;;  %v42_v37 = vld [vmem:[%s4059_s2 + $0xa0] sm:$0xff]  ;;  %v53_v39 = vld [vmem:[%s4059_s2 + $0xf8] sm:$0xff]  ;;  %v60_v40 = vld [vmem:[%s4059_s2 + $0x130] sm:$0xff]  ;;  %v201_v41 = vmul.f32 %v2893_v2, %v38_v34  ;;  %v208_v42 = vmul.f32 %v2893_v2, %v45_v36 }
  0x79   :  { %1201 = vmatprep.subr.bf16.mxu1 %v2615_v57  ;;  %v317_v33 = vpack.c.bf16 %v198_v29, %v191_v28  ;;  %v205_v43 = vmul.f32 %v2905_v11, %v42_v37  ;;  %v212_v44 = vmul.f32 %v2905_v11, %v49_v38  ;;  %v216_v45 = vmul.f32 %v2891_v1, %v53_v39  ;;  %v52_v49 = vld [vmem:[%s4059_s2 + $0xf0] sm:$0xff]  ;;  %v59_v51 = vld [vmem:[%s4059_s2 + $0x128] sm:$0xff]  ;;  %v74_v55 = vld [vmem:[%s4059_s2 + $0x1a0] sm:$0xff] }
  0x7a   :  { %1153 = vmatmul.mubr.bf16.gmra.mrb[28].mxu1 %v360_v58  ;;  %v321_v35 = vpack.c.bf16 %v209_v31, %v202_v30  ;;  %v223_v46 = vmul.f32 %v2891_v1, %v60_v40  ;;  %v320_v47 = vpack.c.bf16 %v208_v42, %v201_v41  ;;  %v56_v52 = vld [vmem:[%s4059_s2 + $0x110] sm:$0xff]  ;;  %v63_v53 = vld [vmem:[%s4059_s2 + $0x148] sm:$0xff]  ;;  %v215_v56 = vmul.f32 %v2893_v2, %v52_v49  ;;  %v66_v62 = vld [vmem:[%s4059_s2 + $0x160] sm:$0xff] }
  0x7b   :  { %1399 = vmatmul.mubr.bf16.gmra.mrb[28].mxu0 %v364_v59  ;;  %1162 = vmatprep.mubr.bf16.mxu1 %v368_v63  ;;  %v324_v48 = vpack.c.bf16 %v212_v44, %v205_v43  ;;  %v67_v54 = vld [vmem:[%s4059_s2 + $0x168] sm:$0xff]  ;;  %v222_v57 = vmul.f32 %v2893_v2, %v59_v51  ;;  %v219_v58 = vmul.f32 %v2905_v11, %v56_v52  ;;  %v70_v5 = vld [vmem:[%s4059_s2 + $0x180] sm:$0xff]  ;;  %v77_v6 = vld [vmem:[%s4059_s2 + $0x1b8] sm:$0xff] }
  0x7c   :  { %1408 = vmatprep.mubr.bf16.mxu0 %v372_v0  ;;  %1202 = vmatpush1.bf16.msra.mxu1 %v2613_v4  ;;  %v328_v50 = vpack.c.bf16 %v223_v46, %v216_v45  ;;  %v226_v59 = vmul.f32 %v2905_v11, %v63_v53  ;;  %v230_v61 = vmul.f32 %v2891_v1, %v67_v54  ;;  %v73_v4 = vld [vmem:[%s4059_s2 + $0x198] sm:$0xff]  ;;  %v80_v24 = vld [vmem:[%s4059_s2 + $0x1d0] sm:$0xff]  ;;  %v87_v25 = vld [vmem:[%s4059_s2 + $0x208] sm:$0xff] }
  0x7d   :  { %1203 = vmatprep.subr.bf16.mxu1 %v2618_v8  ;;  %v237_v63 = vmul.f32 %v2891_v1, %v74_v55  ;;  %v327_v0 = vpack.c.bf16 %v222_v57, %v215_v56  ;;  %v81_v7 = vld [vmem:[%s4059_s2 + $0x1d8] sm:$0xff]  ;;  %v88_v8 = vld [vmem:[%s4059_s2 + $0x210] sm:$0xff]  ;;  %v229_v9 = vmul.f32 %v2893_v2, %v66_v62  ;;  %v236_v10 = vmul.f32 %v2893_v2, %v73_v4  ;;  %v91_v21 = vld [vmem:[%s4059_s2 + $0x228] sm:$0xff] }
  0x7e   :  { %v331_v60 = vpack.c.bf16 %v226_v59, %v219_v58  ;;  %v233_v12 = vmul.f32 %v2905_v11, %v70_v5  ;;  %v240_v13 = vmul.f32 %v2905_v11, %v77_v6  ;;  %v244_v15 = vmul.f32 %v2891_v1, %v81_v7  ;;  %v84_v20 = vld [vmem:[%s4059_s2 + $0x1f0] sm:$0xff]  ;;  %v95_v22 = vld [vmem:[%s4059_s2 + $0x248] sm:$0xff]  ;;  %v102_v23 = vld [vmem:[%s4059_s2 + $0x280] sm:$0xff] }
  0x7f   :  { %v335_v3 = vpack.c.bf16 %v237_v63, %v230_v61  ;;  %v243_v26 = vmul.f32 %v2893_v2, %v80_v24  ;;  %v250_v27 = vmul.f32 %v2893_v2, %v87_v25  ;;  %v247_v28 = vmul.f32 %v2905_v11, %v84_v20  ;;  %v94_v34 = vld [vmem:[%s4059_s2 + $0x240] sm:$0xff]  ;;  %v101_v36 = vld [vmem:[%s4059_s2 + $0x278] sm:$0xff]  ;;  %v116_v40 = vld [vmem:[%s4059_s2 + $0x2f0] sm:$0xff] }
  0x80   :  { %1204 = vmatpush1.bf16.msra.mxu1 %v2616_v16  ;;  %v251_v16 = vmul.f32 %v2891_v1, %v88_v8  ;;  %v254_v29 = vmul.f32 %v2905_v11, %v91_v21  ;;  %v258_v30 = vmul.f32 %v2891_v1, %v95_v22  ;;  %v265_v31 = vmul.f32 %v2891_v1, %v102_v23  ;;  %v98_v37 = vld [vmem:[%s4059_s2 + $0x260] sm:$0xff]  ;;  %v105_v38 = vld [vmem:[%s4059_s2 + $0x298] sm:$0xff]  ;;  %v108_v49 = vld [vmem:[%s4059_s2 + $0x2b0] sm:$0xff] }
  0x81   :  { %v109_v39 = vld [vmem:[%s4059_s2 + $0x2b8] sm:$0xff]  ;;  %v257_v41 = vmul.f32 %v2893_v2, %v94_v34  ;;  %v264_v42 = vmul.f32 %v2893_v2, %v101_v36  ;;  %v261_v43 = vmul.f32 %v2905_v11, %v98_v37  ;;  %v268_v44 = vmul.f32 %v2905_v11, %v105_v38  ;;  %v115_v51 = vld [vmem:[%s4059_s2 + $0x2e8] sm:$0xff]  ;;  %v112_v52 = vld [vmem:[%s4059_s2 + $0x2d0] sm:$0xff] }
  0x82   :  { %1163 = vmatmul.mubr.bf16.gmra.mrb[32].mxu1 %v367_v17  ;;  %v334_v17 = vpack.c.bf16 %v236_v10, %v229_v9  ;;  %v272_v45 = vmul.f32 %v2891_v1, %v109_v39  ;;  %v279_v46 = vmul.f32 %v2891_v1, %v116_v40  ;;  %v119_v53 = vld [vmem:[%s4059_s2 + $0x308] sm:$0xff]  ;;  %v130_v55 = vld [vmem:[%s4059_s2 + $0x360] sm:$0xff]  ;;  %v271_v56 = vmul.f32 %v2893_v2, %v108_v49  ;;  %v129_v4 = vld [vmem:[%s4059_s2 + $0x358] sm:$0xff] }
  0x83   :  { %1409 = vmatmul.mubr.bf16.gmra.mrb[32].mxu0 %v371_v18  ;;  %1205 = vmatprep.mubr.bf16.mxu1 %v314_v19  ;;  %v338_v18 = vpack.c.bf16 %v240_v13, %v233_v12  ;;  %v342_v19 = vpack.c.bf16 %v251_v16, %v244_v15  ;;  %v123_v54 = vld [vmem:[%s4059_s2 + $0x328] sm:$0xff]  ;;  %v278_v57 = vmul.f32 %v2893_v2, %v115_v51  ;;  %v122_v62 = vld [vmem:[%s4059_s2 + $0x320] sm:$0xff]  ;;  %v133_v6 = vld [vmem:[%s4059_s2 + $0x378] sm:$0xff] }
  0x84   :  { %1451 = vmatprep.mubr.bf16.mxu0 %v2679_v14  ;;  %v275_v58 = vmul.f32 %v2905_v11, %v112_v52  ;;  %v282_v59 = vmul.f32 %v2905_v11, %v119_v53  ;;  %v286_v61 = vmul.f32 %v2891_v1, %v123_v54  ;;  %v293_v63 = vmul.f32 %v2891_v1, %v130_v55  ;;  %v126_v5 = vld [vmem:[%s4059_s2 + $0x340] sm:$0xff]  ;;  %v137_v7 = vld [vmem:[%s4059_s2 + $0x398] sm:$0xff]  ;;  %v144_v8 = vld [vmem:[%s4059_s2 + $0x3d0] sm:$0xff] }
  0x85   :  { %v285_v9 = vmul.f32 %v2893_v2, %v122_v62  ;;  %v292_v10 = vmul.f32 %v2893_v2, %v129_v4  ;;  %v289_v12 = vmul.f32 %v2905_v11, %v126_v5  ;;  %v296_v13 = vmul.f32 %v2905_v11, %v133_v6  ;;  %v136_v24 = vld [vmem:[%s4059_s2 + $0x390] sm:$0xff]  ;;  %v143_v25 = vld [vmem:[%s4059_s2 + $0x3c8] sm:$0xff] }
  0x86   :  { %v300_v15 = vmul.f32 %v2891_v1, %v137_v7  ;;  %v307_v16 = vmul.f32 %v2891_v1, %v144_v8  ;;  %v140_v20 = vld [vmem:[%s4059_s2 + $0x3b0] sm:$0xff]  ;;  %v147_v21 = vld [vmem:[%s4059_s2 + $0x3e8] sm:$0xff]  ;;  %v299_v1 = vmul.f32 %v2893_v2, %v136_v24  ;;  %v306_v22 = vmul.f32 %v2893_v2, %v143_v25 }
  0x87   :  { %v303_v23 = vmul.f32 %v2905_v11, %v140_v20 }
  0x8a   :  { %1206 = vmatmul.mubr.bf16.vlgmr.msra.gmra.mrb[0].mxu1 %v313_v32  ;;  %v341_v32 = vpack.c.bf16 %v250_v27, %v243_v26  ;;  %v310_v26 = vmul.f32 %v2905_v11, %v147_v21  ;;  %v369_v27 = vpack.c.bf16 %v306_v22, %v299_v1 }
  0x8b   :  { %2334 = vmatmul.mubr.msk.bf16.vlgmr.msra.gmra.mrb[0].mxu0 %vm1022_vm0, %v317_v33  ;;  %1215 = vmatprep.mubr.bf16.mxu1 %v321_v35  ;;  %v345_v33 = vpack.c.bf16 %v254_v29, %v247_v28  ;;  %v349_v35 = vpack.c.bf16 %v265_v31, %v258_v30 }
  0x8c   :  { %1461 = vmatprep.mubr.bf16.mxu0 %v2679_v14  ;;  %v373_v28 = vpack.c.bf16 %v310_v26, %v303_v23 }
  0x92   :  { %1216 = vmatmul.mubr.bf16.gmra.mrb[4].mxu1 %v320_v47  ;;  %v348_v47 = vpack.c.bf16 %v264_v42, %v257_v41 }
  0x93   :  { %2335 = vmatmul.mubr.msk.bf16.gmra.mrb[4].mxu0 %vm1022_vm0, %v324_v48  ;;  %1225 = vmatprep.mubr.bf16.mxu1 %v328_v50  ;;  %v352_v48 = vpack.c.bf16 %v268_v44, %v261_v43  ;;  %v356_v50 = vpack.c.bf16 %v279_v46, %v272_v45 }
  0x94   :  { %1471 = vmatprep.mubr.bf16.mxu0 %v2679_v14 }
  0x9a   :  { %1226 = vmatmul.mubr.bf16.gmra.mrb[8].mxu1 %v327_v0  ;;  %v355_v0 = vpack.c.bf16 %v278_v57, %v271_v56 }
  0x9b   :  { %2336 = vmatmul.mubr.msk.bf16.gmra.mrb[8].mxu0 %vm1022_vm0, %v331_v60  ;;  %1235 = vmatprep.mubr.bf16.mxu1 %v335_v3  ;;  %v359_v60 = vpack.c.bf16 %v282_v59, %v275_v58  ;;  %v363_v3 = vpack.c.bf16 %v293_v63, %v286_v61 }
  0x9c   :  { %1481 = vmatprep.mubr.bf16.mxu0 %v2679_v14 }
  0xa2   :  { %1236 = vmatmul.mubr.bf16.gmra.mrb[12].mxu1 %v334_v17  ;;  %v362_v17 = vpack.c.bf16 %v292_v10, %v285_v9 }
  0xa3   :  { %2337 = vmatmul.mubr.msk.bf16.gmra.mrb[12].mxu0 %vm1022_vm0, %v338_v18  ;;  %1245 = vmatprep.mubr.bf16.mxu1 %v342_v19  ;;  %v366_v18 = vpack.c.bf16 %v296_v13, %v289_v12  ;;  %v370_v19 = vpack.c.bf16 %v307_v16, %v300_v15 }
  0xa4   :  { %1491 = vmatprep.mubr.bf16.mxu0 %v2679_v14 }
  0xaa   :  { %1246 = vmatmul.mubr.bf16.gmra.mrb[16].mxu1 %v341_v32 }
  0xab   :  { %2338 = vmatmul.mubr.msk.bf16.gmra.mrb[16].mxu0 %vm1022_vm0, %v345_v33  ;;  %1255 = vmatprep.mubr.bf16.mxu1 %v349_v35 }
  0xac   :  { %1501 = vmatprep.mubr.bf16.mxu0 %v2679_v14 }
  0xb2   :  { %1256 = vmatmul.mubr.bf16.gmra.mrb[20].mxu1 %v348_v47 }
  0xb3   :  { %2339 = vmatmul.mubr.msk.bf16.gmra.mrb[20].mxu0 %vm1022_vm0, %v352_v48  ;;  %1265 = vmatprep.mubr.bf16.mxu1 %v356_v50 }
  0xb4   :  { %1511 = vmatprep.mubr.bf16.mxu0 %v2679_v14 }
  0xba   :  { %1266 = vmatmul.mubr.bf16.gmra.mrb[24].mxu1 %v355_v0 }
  0xbb   :  { %2340 = vmatmul.mubr.msk.bf16.gmra.mrb[24].mxu0 %vm1022_vm0, %v359_v60  ;;  %1275 = vmatprep.mubr.bf16.mxu1 %v363_v3 }
  0xbc   :  { %1521 = vmatprep.mubr.bf16.mxu0 %v2679_v14 }
  0xc2   :  { %1276 = vmatmul.mubr.bf16.gmra.mrb[28].mxu1 %v362_v17 }
  0xc3   :  { %2341 = vmatmul.mubr.msk.bf16.gmra.mrb[28].mxu0 %vm1022_vm0, %v366_v18  ;;  %1285 = vmatprep.mubr.bf16.mxu1 %v370_v19 }
  0xc4   :  { %1531 = vmatprep.mubr.bf16.mxu0 %v2679_v14 }
  0xca   :  { %1286 = vmatmul.mubr.bf16.gmra.mrb[32].mxu1 %v369_v27 }
  0xcb   :  { %2342 = vmatmul.mubr.msk.bf16.gmra.mrb[32].mxu0 %vm1022_vm0, %v373_v28 }
 0x15d   :  { %v1207_v29 = vpop.f32.mrb[0].mxu1 }
 0x15e   :  { %v1453_v30 = vpop.f32.mrb[0].mxu0  ;;  %v1209_v32 = vpop.f32.mrb[1].mxu1 }
 0x15f   :  { %v3587_v31 = vadd.f32 %v1453_v30, %v1207_v29  ;;  %v1455_v33 = vpop.f32.mrb[1].mxu0  ;;  %v1211_v34 = vpop.f32.mrb[2].mxu1 }
 0x160   :  { %v3589_v2 = vadd.f32 %v1455_v33, %v1209_v32  ;;  %v1457_v35 = vpop.f32.mrb[2].mxu0  ;;  %v1213_v36 = vpop.f32.mrb[3].mxu1 }
 0x161   :  { %v3591_v11 = vadd.f32 %v1457_v35, %v1211_v34  ;;  %v1459_v14 = vpop.f32.mrb[3].mxu0  ;;  %v1634_v59 = vmul.f32 %v3587_v31, %v3587_v31 }
 0x162   :  { %v3593_v37 = vadd.f32 %v1459_v14, %v1213_v36  ;;  %v1543_v38 = vsel %vm1542_vm1, %v3589_v2, 0.0  ;;  %v1635_v42 = vmul.f32 %v3589_v2, %v3589_v2 }
 0x163   :  { %v1544_v39 = vadd.f32 %v3587_v31, %v1543_v38  ;;  %v1636_v43 = vmul.f32 %v3591_v11, %v3591_v11 }
 0x164   :  { %v1637_v40 = vmul.f32 %v3593_v37, %v3593_v37  ;;  %v1547_v41 = vsel %vm1542_vm1, %v3593_v37, 0.0  ;;  %v1670_v55 = vsel %vm1542_vm1, %v1635_v42, 0.0 }
 0x165   :  { %1545 = vadd.xlane.f32.xlu0 %v1544_v39  ;;  %v1217_v44 = vpop.f32.mrb[4].mxu1  ;;  %v1548_v51 = vadd.f32 %v3591_v11, %v1547_v41  ;;  %v1671_v60 = vadd.f32 %v1670_v55, %v1634_v59 }
 0x166   :  { %v1463_v45 = vpop.f32.mrb[4].mxu0  ;;  %v1674_v46 = vsel %vm1542_vm1, %v1637_v40, 0.0  ;;  %v1219_v48 = vpop.f32.mrb[5].mxu1 }
 0x167   :  { %v3607_v47 = vadd.f32 %v1463_v45, %v1217_v44  ;;  %v1465_v49 = vpop.f32.mrb[5].mxu0  ;;  %v1675_v50 = vadd.f32 %v1674_v46, %v1636_v43  ;;  %v1221_v53 = vpop.f32.mrb[6].mxu1 }
 0x168   :  { %v3610_v52 = vadd.f32 %v1465_v49, %v1219_v48  ;;  %v1467_v54 = vpop.f32.mrb[6].mxu0  ;;  %v1223_v58 = vpop.f32.mrb[7].mxu1 }
 0x169   :  { %v3613_v56 = vadd.f32 %v1467_v54, %v1221_v53  ;;  %v1469_v57 = vpop.f32.mrb[7].mxu0  ;;  %1676 = vadd.xlane.f32.xlu1 %v1675_v50  ;;  %1549 = vadd.xlane.f32.xlu0 %v1548_v51  ;;  %v1638_v6 = vmul.f32 %v3607_v47, %v3607_v47 }
 0x16a   :  { %v3617_v61 = vadd.f32 %v1469_v57, %v1223_v58  ;;  %v1551_v63 = vsel %vm1542_vm1, %v3610_v52, 0.0  ;;  %v1639_v0 = vmul.f32 %v3610_v52, %v3610_v52 }
 0x16b   :  { %v1552_v62 = vadd.f32 %v3607_v47, %v1551_v63  ;;  %v1640_v21 = vmul.f32 %v3613_v56, %v3613_v56 }
 0x16c   :  { %v1678_v3 = vsel %vm1542_vm1, %v1639_v0, 0.0  ;;  %v1555_v4 = vsel %vm1542_vm1, %v3617_v61, 0.0  ;;  %v1641_v5 = vmul.f32 %v3617_v61, %v3617_v61 }
 0x16d   :  { %1672 = vadd.xlane.f32.xlu0 %v1671_v60  ;;  %1553 = vadd.xlane.f32.xlu1 %v1552_v62  ;;  %v1227_v7 = vpop.f32.mrb[8].mxu1  ;;  %v1679_v13 = vadd.f32 %v1678_v3, %v1638_v6  ;;  %v1556_v15 = vadd.f32 %v3613_v56, %v1555_v4 }
 0x16e   :  { %v1473_v8 = vpop.f32.mrb[8].mxu0  ;;  %v1229_v10 = vpop.f32.mrb[9].mxu1  ;;  %v1682_v24 = vsel %vm1542_vm1, %v1641_v5, 0.0 }
 0x16f   :  { %v3631_v9 = vadd.f32 %v1473_v8, %v1227_v7  ;;  %v1475_v12 = vpop.f32.mrb[9].mxu0  ;;  %v1231_v17 = vpop.f32.mrb[10].mxu1  ;;  %v1683_v26 = vadd.f32 %v1682_v24, %v1640_v21 }
 0x170   :  { %v3634_v16 = vadd.f32 %v1475_v12, %v1229_v10  ;;  %v1477_v18 = vpop.f32.mrb[10].mxu0  ;;  %v1233_v20 = vpop.f32.mrb[11].mxu1 }
 0x171   :  { %v3637_v19 = vadd.f32 %v1477_v18, %v1231_v17  ;;  %v1479_v25 = vpop.f32.mrb[11].mxu0  ;;  %1680 = vadd.xlane.f32.xlu0 %v1679_v13  ;;  %1557 = vadd.xlane.f32.xlu1 %v1556_v15  ;;  %v1642_v32 = vmul.f32 %v3631_v9, %v3631_v9 }
 0x172   :  { %v3641_v1 = vadd.f32 %v1479_v25, %v1233_v20  ;;  %v1559_v22 = vsel %vm1542_vm1, %v3634_v16, 0.0  ;;  %v1643_v23 = vmul.f32 %v3634_v16, %v3634_v16 }
 0x173   :  { %v1560_v27 = vadd.f32 %v3631_v9, %v1559_v22  ;;  %v1644_v48 = vmul.f32 %v3637_v19, %v3637_v19 }
 0x174   :  { %v1686_v28 = vsel %vm1542_vm1, %v1643_v23, 0.0  ;;  %v1563_v29 = vsel %vm1542_vm1, %v3641_v1, 0.0  ;;  %v1645_v30 = vmul.f32 %v3641_v1, %v3641_v1 }
 0x175   :  { %1684 = vadd.xlane.f32.xlu1 %v1683_v26  ;;  %1561 = vadd.xlane.f32.xlu0 %v1560_v27  ;;  %v1237_v33 = vpop.f32.mrb[12].mxu1  ;;  %v1687_v38 = vadd.f32 %v1686_v28, %v1642_v32  ;;  %v1564_v39 = vadd.f32 %v3637_v19, %v1563_v29 }
 0x176   :  { %v1483_v34 = vpop.f32.mrb[12].mxu0  ;;  %v1239_v36 = vpop.f32.mrb[13].mxu1  ;;  %v1690_v43 = vsel %vm1542_vm1, %v1645_v30, 0.0 }
 0x177   :  { %v3655_v35 = vadd.f32 %v1483_v34, %v1237_v33  ;;  %v1485_v14 = vpop.f32.mrb[13].mxu0  ;;  %v1241_v41 = vpop.f32.mrb[14].mxu1  ;;  %v1691_v53 = vadd.f32 %v1690_v43, %v1644_v48 }
 0x178   :  { %v3658_v40 = vadd.f32 %v1485_v14, %v1239_v36  ;;  %v1487_v42 = vpop.f32.mrb[14].mxu0  ;;  %v1243_v46 = vpop.f32.mrb[15].mxu1 }
 0x179   :  { %v3661_v44 = vadd.f32 %v1487_v42, %v1241_v41  ;;  %v1489_v45 = vpop.f32.mrb[15].mxu0  ;;  %1688 = vadd.xlane.f32.xlu0 %v1687_v38  ;;  %1565 = vadd.xlane.f32.xlu1 %v1564_v39  ;;  %v1646_v59 = vmul.f32 %v3655_v35, %v3655_v35 }
 0x17a   :  { %v3665_v49 = vadd.f32 %v1489_v45, %v1243_v46  ;;  %v1567_v50 = vsel %vm1542_vm1, %v3658_v40, 0.0  ;;  %v1647_v51 = vmul.f32 %v3658_v40, %v3658_v40 }
 0x17b   :  { %v1568_v54 = vadd.f32 %v3655_v35, %v1567_v50  ;;  %v1648_v17 = vmul.f32 %v3661_v44, %v3661_v44 }
 0x17c   :  { %v1694_v55 = vsel %vm1542_vm1, %v1647_v51, 0.0  ;;  %v1571_v57 = vsel %vm1542_vm1, %v3665_v49, 0.0  ;;  %v1649_v58 = vmul.f32 %v3665_v49, %v3665_v49 }
 0x17d   :  { %1692 = vadd.xlane.f32.xlu1 %v1691_v53  ;;  %1569 = vadd.xlane.f32.xlu0 %v1568_v54  ;;  %v1247_v63 = vpop.f32.mrb[16].mxu1  ;;  %v1695_v4 = vadd.f32 %v1694_v55, %v1646_v59  ;;  %v1572_v5 = vadd.f32 %v3661_v44, %v1571_v57 }
 0x17e   :  { %v1493_v0 = vpop.f32.mrb[16].mxu0  ;;  %v1249_v62 = vpop.f32.mrb[17].mxu1  ;;  %v1698_v10 = vsel %vm1542_vm1, %v1649_v58, 0.0 }
 0x17f   :  { %v3679_v60 = vadd.f32 %v1493_v0, %v1247_v63  ;;  %v1495_v3 = vpop.f32.mrb[17].mxu0  ;;  %v1251_v7 = vpop.f32.mrb[18].mxu1  ;;  %v1699_v20 = vadd.f32 %v1698_v10, %v1648_v17 }
 0x180   :  { %v3682_v6 = vadd.f32 %v1495_v3, %v1249_v62  ;;  %v1497_v8 = vpop.f32.mrb[18].mxu0  ;;  %v1253_v15 = vpop.f32.mrb[19].mxu1 }
 0x181   :  { %v3685_v12 = vadd.f32 %v1497_v8, %v1251_v7  ;;  %v1499_v13 = vpop.f32.mrb[19].mxu0  ;;  %1696 = vadd.xlane.f32.xlu0 %v1695_v4  ;;  %1573 = vadd.xlane.f32.xlu1 %v1572_v5  ;;  %v1650_v27 = vmul.f32 %v3679_v60, %v3679_v60 }
 0x182   :  { %v3689_v18 = vadd.f32 %v1499_v13, %v1253_v15  ;;  %v1575_v24 = vsel %vm1542_vm1, %v3682_v6, 0.0  ;;  %v1651_v25 = vmul.f32 %v3682_v6, %v3682_v6 }
 0x183   :  { %v1576_v21 = vadd.f32 %v3679_v60, %v1575_v24  ;;  %v1652_v46 = vmul.f32 %v3685_v12, %v3685_v12 }
 0x184   :  { %v1702_v22 = vsel %vm1542_vm1, %v1651_v25, 0.0  ;;  %v1579_v23 = vsel %vm1542_vm1, %v3689_v18, 0.0  ;;  %v1653_v26 = vmul.f32 %v3689_v18, %v3689_v18 }
 0x185   :  { %1700 = vadd.xlane.f32.xlu1 %v1699_v20  ;;  %1577 = vadd.xlane.f32.xlu0 %v1576_v21  ;;  %v1257_v28 = vpop.f32.mrb[20].mxu1  ;;  %v1703_v34 = vadd.f32 %v1702_v22, %v1650_v27  ;;  %v1580_v36 = vadd.f32 %v3685_v12, %v1579_v23 }
 0x186   :  { %v1503_v29 = vpop.f32.mrb[20].mxu0  ;;  %v1259_v32 = vpop.f32.mrb[21].mxu1  ;;  %v1706_v41 = vsel %vm1542_vm1, %v1653_v26, 0.0 }
 0x187   :  { %v3703_v30 = vadd.f32 %v1503_v29, %v1257_v28  ;;  %v1505_v33 = vpop.f32.mrb[21].mxu0  ;;  %v1261_v38 = vpop.f32.mrb[22].mxu1  ;;  %v1707_v53 = vadd.f32 %v1706_v41, %v1652_v46 }
 0x188   :  { %v3706_v14 = vadd.f32 %v1505_v33, %v1259_v32  ;;  %v1507_v39 = vpop.f32.mrb[22].mxu0  ;;  %v1263_v45 = vpop.f32.mrb[23].mxu1 }
 0x189   :  { %v3709_v42 = vadd.f32 %v1507_v39, %v1261_v38  ;;  %v1509_v43 = vpop.f32.mrb[23].mxu0  ;;  %1704 = vadd.xlane.f32.xlu0 %v1703_v34  ;;  %1581 = vadd.xlane.f32.xlu1 %v1580_v36  ;;  %v1654_v59 = vmul.f32 %v3703_v30, %v3703_v30 }
 0x18a   :  { %v3713_v48 = vadd.f32 %v1509_v43, %v1263_v45  ;;  %v1583_v50 = vsel %vm1542_vm1, %v3706_v14, 0.0  ;;  %v1655_v51 = vmul.f32 %v3706_v14, %v3706_v14 }
 0x18b   :  { %v1584_v54 = vadd.f32 %v3703_v30, %v1583_v50  ;;  %v1656_v20 = vmul.f32 %v3709_v42, %v3709_v42 }
 0x18c   :  { %v1710_v55 = vsel %vm1542_vm1, %v1655_v51, 0.0  ;;  %v1587_v57 = vsel %vm1542_vm1, %v3713_v48, 0.0  ;;  %v1657_v58 = vmul.f32 %v3713_v48, %v3713_v48 }
 0x18d   :  { %1708 = vadd.xlane.f32.xlu1 %v1707_v53  ;;  %1585 = vadd.xlane.f32.xlu0 %v1584_v54  ;;  %v1267_v63 = vpop.f32.mrb[24].mxu1  ;;  %v1711_v5 = vadd.f32 %v1710_v55, %v1654_v59  ;;  %v1588_v7 = vadd.f32 %v3709_v42, %v1587_v57 }
 0x18e   :  { %v1513_v0 = vpop.f32.mrb[24].mxu0  ;;  %v1269_v3 = vpop.f32.mrb[25].mxu1  ;;  %v1714_v15 = vsel %vm1542_vm1, %v1657_v58, 0.0 }
 0x18f   :  { %v3727_v62 = vadd.f32 %v1513_v0, %v1267_v63  ;;  %v1515_v4 = vpop.f32.mrb[25].mxu0  ;;  %v1271_v10 = vpop.f32.mrb[26].mxu1  ;;  %v1715_v26 = vadd.f32 %v1714_v15, %v1656_v20 }
 0x190   :  { %v3730_v8 = vadd.f32 %v1515_v4, %v1269_v3  ;;  %v1517_v13 = vpop.f32.mrb[26].mxu0  ;;  %v1273_v25 = vpop.f32.mrb[27].mxu1 }
 0x191   :  { %v3733_v17 = vadd.f32 %v1517_v13, %v1271_v10  ;;  %v1519_v24 = vpop.f32.mrb[27].mxu0  ;;  %1712 = vadd.xlane.f32.xlu0 %v1711_v5  ;;  %1589 = vadd.xlane.f32.xlu1 %v1588_v7  ;;  %v1658_v33 = vmul.f32 %v3727_v62, %v3727_v62 }
 0x192   :  { %v3737_v21 = vadd.f32 %v1519_v24, %v1273_v25  ;;  %v1591_v22 = vsel %vm1542_vm1, %v3730_v8, 0.0  ;;  %v1659_v23 = vmul.f32 %v3730_v8, %v3730_v8 }
 0x193   :  { %v1592_v27 = vadd.f32 %v3727_v62, %v1591_v22  ;;  %v1660_v58 = vmul.f32 %v3733_v17, %v3733_v17 }
 0x194   :  { %v1718_v28 = vsel %vm1542_vm1, %v1659_v23, 0.0  ;;  %v1595_v29 = vsel %vm1542_vm1, %v3737_v21, 0.0  ;;  %v1661_v32 = vmul.f32 %v3737_v21, %v3737_v21 }
 0x195   :  { %1716 = vadd.xlane.f32.xlu1 %v1715_v26  ;;  %1593 = vadd.xlane.f32.xlu0 %v1592_v27  ;;  %v1277_v34 = vpop.f32.mrb[28].mxu1  ;;  %v1719_v43 = vadd.f32 %v1718_v28, %v1658_v33  ;;  %v1596_v45 = vadd.f32 %v3733_v17, %v1595_v29 }
 0x196   :  { %v1523_v36 = vpop.f32.mrb[28].mxu0  ;;  %v1279_v39 = vpop.f32.mrb[29].mxu1  ;;  %v1722_v53 = vsel %vm1542_vm1, %v1661_v32, 0.0 }
 0x197   :  { %v3751_v38 = vadd.f32 %v1523_v36, %v1277_v34  ;;  %v1525_v41 = vpop.f32.mrb[29].mxu0  ;;  %v1281_v50 = vpop.f32.mrb[30].mxu1  ;;  %v1723_v3 = vadd.f32 %v1722_v53, %v1660_v58 }
 0x198   :  { %v3754_v46 = vadd.f32 %v1525_v41, %v1279_v39  ;;  %v1527_v51 = vpop.f32.mrb[30].mxu0  ;;  %v1283_v57 = vpop.f32.mrb[31].mxu1 }
 0x199   :  { %v3757_v54 = vadd.f32 %v1527_v51, %v1281_v50  ;;  %v1529_v55 = vpop.f32.mrb[31].mxu0  ;;  %1720 = vadd.xlane.f32.xlu0 %v1719_v43  ;;  %1597 = vadd.xlane.f32.xlu1 %v1596_v45  ;;  %v1662_v13 = vmul.f32 %v3751_v38, %v3751_v38 }
 0x19a   :  { %v3761_v59 = vadd.f32 %v1529_v55, %v1283_v57  ;;  %v1599_v63 = vsel %vm1542_vm1, %v3754_v46, 0.0  ;;  %v1663_v0 = vmul.f32 %v3754_v46, %v3754_v46 }
 0x19b   :  { %v1600_v4 = vadd.f32 %v3751_v38, %v1599_v63  ;;  %v1664_v39 = vmul.f32 %v3757_v54, %v3757_v54 }
 0x19c   :  { %v1726_v5 = vsel %vm1542_vm1, %v1663_v0, 0.0  ;;  %v1603_v7 = vsel %vm1542_vm1, %v3761_v59, 0.0  ;;  %v1665_v10 = vmul.f32 %v3761_v59, %v3761_v59 }
 0x19d   :  { %1724 = vadd.xlane.f32.xlu1 %v1723_v3  ;;  %1601 = vadd.xlane.f32.xlu0 %v1600_v4  ;;  %v1287_v15 = vpop.f32.mrb[32].mxu1  ;;  %v1727_v23 = vadd.f32 %v1726_v5, %v1662_v13  ;;  %v1604_v26 = vadd.f32 %v3757_v54, %v1603_v7 }
 0x19e   :  { %v1533_v24 = vpop.f32.mrb[32].mxu0  ;;  %v1289_v20 = vpop.f32.mrb[33].mxu1  ;;  %v1730_v32 = vsel %vm1542_vm1, %v1665_v10, 0.0 }
 0x19f   :  { %v3775_v25 = vadd.f32 %v1533_v24, %v1287_v15  ;;  %v1535_v22 = vpop.f32.mrb[33].mxu0  ;;  %v1291_v28 = vpop.f32.mrb[34].mxu1  ;;  %v1731_v50 = vadd.f32 %v1730_v32, %v1664_v39 }
 0x1a0   :  { %v3778_v27 = vadd.f32 %v1535_v22, %v1289_v20  ;;  %v1537_v29 = vpop.f32.mrb[34].mxu0  ;;  %v1293_v36 = vpop.f32.mrb[35].mxu1 }
 0x1a1   :  { %v3781_v33 = vadd.f32 %v1537_v29, %v1291_v28  ;;  %v1539_v34 = vpop.f32.mrb[35].mxu0  ;;  %1728 = vadd.xlane.f32.xlu0 %v1727_v23  ;;  %1605 = vadd.xlane.f32.xlu1 %v1604_v26  ;;  %v1666_v58 = vmul.f32 %v3775_v25, %v3775_v25 }
 0x1a2   :  { %4064 = vst [vmem:[#allocation5_spill] sm:$0xff] %v3778_v27  ;;  %v3785_v41 = vadd.f32 %v1539_v34, %v1293_v36  ;;  %v1607_v43 = vsel %vm1542_vm1, %v3778_v27, 0.0  ;;  %v1667_v45 = vmul.f32 %v3778_v27, %v3778_v27 }
 0x1a3   :  { %v1608_v51 = vadd.f32 %v3775_v25, %v1607_v43  ;;  %v1668_v4 = vmul.f32 %v3781_v33, %v3781_v33 }
 0x1a4   :  { %v1734_v53 = vsel %vm1542_vm1, %v1667_v45, 0.0  ;;  %v1611_v55 = vsel %vm1542_vm1, %v3785_v41, 0.0  ;;  %v1669_v57 = vmul.f32 %v3785_v41, %v3785_v41 }
 0x1a5   :  { %1732 = vadd.xlane.f32.xlu1 %v1731_v50  ;;  %1609 = vadd.xlane.f32.xlu0 %v1608_v51  ;;  %v1735_v63 = vadd.f32 %v1734_v53, %v1666_v58  ;;  %v1612_v0 = vadd.f32 %v3781_v33, %v1611_v55 }
 0x1a6   :  { %v1738_v3 = vsel %vm1542_vm1, %v1669_v57, 0.0 }
 0x1a7   :  { %v1739_v5 = vadd.f32 %v1738_v3, %v1668_v4 }
 0x1a9   :  { %1736 = vadd.xlane.f32.xlu0 %v1735_v63  ;;  %1613 = vadd.xlane.f32.xlu1 %v1612_v0 }
 0x1ad   :  { %1740 = vadd.xlane.f32.xlu1 %v1739_v5 }
 0x1f2   :  { %v1546_v7 = vpop.xlane.xlu0 %1545 }
 0x1f3   :  { %v1616_v15 = vmul.f32 0.0051020407, %v1546_v7 }
 0x1f5   :  { %v1760_v28 = vmul.f32 %v1616_v15, %v1616_v15 }
 0x1f6   :  { %v1677_v10 = vpop.xlane.xlu1 %1676  ;;  %v1550_v13 = vpop.xlane.xlu0 %1549 }
 0x1f7   :  { %v1617_v24 = vmul.f32 0.0051020407, %v1550_v13  ;;  %v1743_v20 = vmul.f32 0.0051020407, %v1677_v10  ;;  %v1797_v10 = vld [vmem:[%s4060_s3 + $0x8] sm:$0xff] }
 0x1f9   :  { %v1761_v22 = vmul.f32 %v1617_v24, %v1617_v24 }
 0x1fa   :  { %v1673_v23 = vpop.xlane.xlu0 %1672  ;;  %v1554_v26 = vpop.xlane.xlu1 %1553 }
 0x1fb   :  { %v1779_v29 = vsub.f32 %v1743_v20, %v1761_v22  ;;  %v1742_v32 = vmul.f32 0.0051020407, %v1673_v23  ;;  %v3803_v34 = vmul.f32 0.0051020407, %v1554_v26 }
 0x1fd   :  { %v1815_v36 = vadd.f32 1e-05, %v1779_v29  ;;  %v1778_v39 = vsub.f32 %v1742_v32, %v1760_v28  ;;  %v1762_v43 = vmul.f32 %v3803_v34, %v3803_v34  ;;  %v1796_v32 = vld [vmem:[%s4060_s3] sm:$0xff] }
 0x1fe   :  { %v1681_v45 = vpop.xlane.xlu0 %1680  ;;  %v1558_v50 = vpop.xlane.xlu1 %1557 }
 0x1ff   :  { %2619 = vrsqrt.f32 %v1815_v36  ;;  %v1814_v51 = vadd.f32 1e-05, %v1778_v39  ;;  %v1744_v53 = vmul.f32 0.0051020407, %v1681_v45  ;;  %v3807_v55 = vmul.f32 0.0051020407, %v1558_v50 }
 0x201   :  { %2621 = vrsqrt.f32 %v1814_v51  ;;  %v1780_v57 = vsub.f32 %v1744_v53, %v1762_v43  ;;  %v1763_v3 = vmul.f32 %v3807_v55, %v3807_v55 }
 0x202   :  { %v1685_v58 = vpop.xlane.xlu1 %1684  ;;  %v1562_v63 = vpop.xlane.xlu0 %1561 }
 0x203   :  { %v1816_v0 = vadd.f32 1e-05, %v1780_v57  ;;  %v1745_v4 = vmul.f32 0.0051020407, %v1685_v58  ;;  %v3811_v7 = vmul.f32 0.0051020407, %v1562_v63 }
 0x205   :  { %v1781_v5 = vsub.f32 %v1745_v4, %v1763_v3  ;;  %2623 = vrsqrt.f32 %v1816_v0  ;;  %v1764_v29 = vmul.f32 %v3811_v7, %v3811_v7  ;;  %v1869_v0 = vld [vmem:[%s4061_s4 + $0x8] sm:$0xff]  ;;  %v1868_v3 = vld [vmem:[%s4061_s4] sm:$0xff] }
 0x206   :  { %v1689_v13 = vpop.xlane.xlu0 %1688  ;;  %v1566_v20 = vpop.xlane.xlu1 %1565 }
 0x207   :  { %v1817_v22 = vadd.f32 1e-05, %v1781_v5  ;;  %v1746_v23 = vmul.f32 0.0051020407, %v1689_v13  ;;  %v3816_v26 = vmul.f32 0.0051020407, %v1566_v20 }
 0x209   :  { %v2620_v28 = vpop.eup %2619  ;;  %2625 = vrsqrt.f32 %v1817_v22  ;;  %v1782_v50 = vsub.f32 %v1746_v23, %v1764_v29  ;;  %v1765_v51 = vmul.f32 %v3816_v26, %v3816_v26 }
 0x20a   :  { %v1851_v36 = vmul.f32 %v2620_v28, %v1797_v10  ;;  %v1693_v39 = vpop.xlane.xlu1 %1692  ;;  %v1570_v43 = vpop.xlane.xlu0 %1569 }
 0x20b   :  { %v2622_v45 = vpop.eup %2621  ;;  %v1747_v53 = vmul.f32 0.0051020407, %v1693_v39  ;;  %v1818_v13 = vadd.f32 1e-05, %v1782_v50  ;;  %v3833_v29 = vmul.f32 0.0051020407, %v1570_v43 }
 0x20c   :  { %v1887_v57 = vmul.f32 %v1851_v36, %v1617_v24  ;;  %1929 = vperm.xlu1 %2456, %v1851_v36   ;;  %v1850_v58 = vmul.f32 %v2622_v45, %v1796_v32  ;;  %v1798_v32 = vld [vmem:[%s4060_s3 + $0x10] sm:$0xff]  ;;  %v1799_v36 = vld [vmem:[%s4060_s3 + $0x18] sm:$0xff] }
 0x20d   :  { %v1783_v63 = vsub.f32 %v1747_v53, %v1765_v51 }
 0x20e   :  { %v1697_v4 = vpop.xlane.xlu0 %1696  ;;  %v1574_v5 = vpop.xlane.xlu1 %1573  ;;  %1924 = vperm.xlu0 %2455, %v1850_v58   ;;  %v1886_v10 = vmul.f32 %v1850_v58, %v1616_v15  ;;  %v1905_v24 = vsub.f32 %v1869_v0, %v1887_v57  ;;  %v1766_v58 = vmul.f32 %v3833_v29, %v3833_v29  ;;  %v1871_v0 = vld [vmem:[%s4061_s4 + $0x18] sm:$0xff] }
 0x20f   :  { %v1819_v20 = vadd.f32 1e-05, %v1783_v63  ;;  %v3831_v22 = vmul.f32 0.0051020407, %v1574_v5  ;;  %v2624_v28 = vpop.eup %2623  ;;  %v1748_v50 = vmul.f32 0.0051020407, %v1697_v4 }
 0x210   :  { %v1904_v23 = vsub.f32 %v1868_v3, %v1886_v10  ;;  %v1852_v53 = vmul.f32 %v2624_v28, %v1798_v32  ;;  %v1870_v32 = vld [vmem:[%s4061_s4 + $0x10] sm:$0xff] }
 0x211   :  { %2627 = vrsqrt.f32 %v1819_v20  ;;  %v1767_v51 = vmul.f32 %v3831_v22, %v3831_v22  ;;  %v1784_v4 = vsub.f32 %v1748_v50, %v1766_v58 }
 0x212   :  { %v1701_v39 = vpop.xlane.xlu1 %1700  ;;  %v1578_v15 = vpop.xlane.xlu0 %1577  ;;  %2055 = vperm.xlu0 %2455, %v1905_v24   ;;  %2050 = vperm.xlu1 %2456, %v1904_v23   ;;  %2629 = vrsqrt.f32 %v1818_v13  ;;  %v1888_v23 = vmul.f32 %v1852_v53, %v3803_v34 }
 0x213   :  { %v2626_v45 = vpop.eup %2625  ;;  %v1749_v43 = vmul.f32 0.0051020407, %v1701_v39  ;;  %v3852_v28 = vmul.f32 0.0051020407, %v1578_v15  ;;  %v1820_v50 = vadd.f32 1e-05, %v1784_v4 }
 0x214   :  { %v1853_v57 = vmul.f32 %v2626_v45, %v1799_v36  ;;  %v1801_v36 = vld [vmem:[%s4060_s3 + $0x28] sm:$0xff] }
 0x215   :  { %v1785_v63 = vsub.f32 %v1749_v43, %v1767_v51  ;;  %v1906_v43 = vsub.f32 %v1870_v32, %v1888_v23 }
 0x216   :  { %v1705_v3 = vpop.xlane.xlu0 %1704  ;;  %v1582_v5 = vpop.xlane.xlu1 %1581  ;;  %1934 = vperm.xlu1 %2456, %v1852_v53   ;;  %v1889_v10 = vmul.f32 %v1853_v57, %v3807_v55 }
 0x217   :  { %v1821_v13 = vadd.f32 1e-05, %v1785_v63  ;;  %v3849_v20 = vmul.f32 0.0051020407, %v1582_v5  ;;  %v1750_v51 = vmul.f32 0.0051020407, %v1705_v3  ;;  %v1768_v63 = vmul.f32 %v3852_v28, %v3852_v28 }
 0x218   :  { %v1907_v24 = vsub.f32 %v1871_v0, %v1889_v10  ;;  %v1873_v5 = vld [vmem:[%s4061_s4 + $0x28] sm:$0xff] }
 0x219   :  { %2631 = vrsqrt.f32 %v1821_v13  ;;  %v1769_v34 = vmul.f32 %v3849_v20, %v3849_v20  ;;  %v1786_v13 = vsub.f32 %v1750_v51, %v1768_v63 }
 0x21a   :  { %v1709_v39 = vpop.xlane.xlu1 %1708  ;;  %v1586_v55 = vpop.xlane.xlu0 %1585  ;;  %2065 = vperm.xlu0 %2455, %v1907_v24   ;;  %1939 = vperm.xlu1 %2456, %v1853_v57   ;;  %v1800_v57 = vld [vmem:[%s4060_s3 + $0x20] sm:$0xff]  ;;  %2633 = vrsqrt.f32 %v1820_v50 }
 0x21b   :  { %v2628_v45 = vpop.eup %2627  ;;  %v1751_v15 = vmul.f32 0.0051020407, %v1709_v39  ;;  %v3873_v39 = vmul.f32 0.0051020407, %v1586_v55 }
 0x21c   :  { %v1855_v53 = vmul.f32 %v2628_v45, %v1801_v36  ;;  %v2630_v58 = vpop.eup %2629  ;;  %v1803_v45 = vld [vmem:[%s4060_s3 + $0x38] sm:$0xff] }
 0x21d   :  { %v1787_v0 = vsub.f32 %v1751_v15, %v1769_v34  ;;  %v1854_v36 = vmul.f32 %v2630_v58, %v1800_v57  ;;  %v1770_v55 = vmul.f32 %v3873_v39, %v3873_v39  ;;  %v1875_v57 = vld [vmem:[%s4061_s4 + $0x38] sm:$0xff] }
 0x21e   :  { %v1713_v3 = vpop.xlane.xlu0 %1712  ;;  %v1590_v10 = vpop.xlane.xlu1 %1589  ;;  %2060 = vperm.xlu1 %2456, %v1906_v43   ;;  %v1891_v4 = vmul.f32 %v1855_v53, %v3816_v26  ;;  %v1822_v26 = vadd.f32 1e-05, %v1786_v13 }
 0x21f   :  { %v1823_v24 = vadd.f32 1e-05, %v1787_v0  ;;  %v3871_v23 = vmul.f32 0.0051020407, %v1590_v10  ;;  %v1752_v50 = vmul.f32 0.0051020407, %v1713_v3  ;;  %v1890_v58 = vmul.f32 %v1854_v36, %v3811_v7 }
 0x220   :  { %v1909_v32 = vsub.f32 %v1873_v5, %v1891_v4  ;;  %v1872_v10 = vld [vmem:[%s4061_s4 + $0x20] sm:$0xff] }
 0x221   :  { %2635 = vrsqrt.f32 %v1823_v24  ;;  %v1771_v51 = vmul.f32 %v3871_v23, %v3871_v23  ;;  %v1788_v24 = vsub.f32 %v1752_v50, %v1770_v55 }
 0x222   :  { %v1717_v34 = vpop.xlane.xlu1 %1716  ;;  %v1594_v15 = vpop.xlane.xlu0 %1593  ;;  %2075 = vperm.xlu0 %2455, %v1909_v32   ;;  %1944 = vperm.xlu1 %2456, %v1854_v36   ;;  %2637 = vrsqrt.f32 %v1822_v26 }
 0x223   :  { %v2632_v43 = vpop.eup %2631  ;;  %v1753_v63 = vmul.f32 0.0051020407, %v1717_v34 }
 0x224   :  { %v1857_v0 = vmul.f32 %v2632_v43, %v1803_v45  ;;  %v1908_v45 = vsub.f32 %v1872_v10, %v1890_v58  ;;  %v2634_v34 = vpop.eup %2633  ;;  %v3892_v43 = vmul.f32 0.0051020407, %v1594_v15 }
 0x225   :  { %v1789_v5 = vsub.f32 %v1753_v63, %v1771_v51  ;;  %v1805_v51 = vld [vmem:[%s4060_s3 + $0x48] sm:$0xff]  ;;  %v1824_v63 = vadd.f32 1e-05, %v1788_v24 }
 0x226   :  { %v1721_v3 = vpop.xlane.xlu0 %1720  ;;  %v1598_v4 = vpop.xlane.xlu1 %1597  ;;  %1949 = vperm.xlu1 %2456, %v1855_v53   ;;  %v1893_v13 = vmul.f32 %v1857_v0, %v3831_v22  ;;  %v1802_v53 = vld [vmem:[%s4060_s3 + $0x30] sm:$0xff]  ;;  %v1772_v10 = vmul.f32 %v3892_v43, %v3892_v43 }
 0x227   :  { %v1825_v7 = vadd.f32 1e-05, %v1789_v5  ;;  %v3890_v32 = vmul.f32 0.0051020407, %v1598_v4  ;;  %v1754_v55 = vmul.f32 0.0051020407, %v1721_v3 }
 0x228   :  { %v1911_v36 = vsub.f32 %v1875_v57, %v1893_v13  ;;  %v1856_v57 = vmul.f32 %v2634_v34, %v1802_v53  ;;  %v1877_v13 = vld [vmem:[%s4061_s4 + $0x48] sm:$0xff] }
 0x229   :  { %2639 = vrsqrt.f32 %v1825_v7  ;;  %v1773_v58 = vmul.f32 %v3890_v32, %v3890_v32  ;;  %v1790_v24 = vsub.f32 %v1754_v55, %v1772_v10 }
 0x22a   :  { %v1725_v22 = vpop.xlane.xlu1 %1724  ;;  %v1602_v26 = vpop.xlane.xlu0 %1601  ;;  %2085 = vperm.xlu0 %2455, %v1911_v36   ;;  %2070 = vperm.xlu1 %2456, %v1908_v45   ;;  %2641 = vrsqrt.f32 %v1824_v63  ;;  %v1804_v63 = vld [vmem:[%s4060_s3 + $0x40] sm:$0xff] }
 0x22b   :  { %v2636_v50 = vpop.eup %2635  ;;  %v1755_v15 = vmul.f32 0.0051020407, %v1725_v22 }
 0x22c   :  { %v1859_v5 = vmul.f32 %v2636_v50, %v1805_v51  ;;  %v1892_v51 = vmul.f32 %v1856_v57, %v3833_v29  ;;  %v2638_v53 = vpop.eup %2637  ;;  %v3911_v50 = vmul.f32 0.0051020407, %v1602_v26 }
 0x22d   :  { %v1791_v4 = vsub.f32 %v1755_v15, %v1773_v58  ;;  %v1807_v58 = vld [vmem:[%s4060_s3 + $0x58] sm:$0xff] }
 0x22e   :  { %v1729_v7 = vpop.xlane.xlu0 %1728  ;;  %v1606_v36 = vpop.xlane.xlu1 %1605  ;;  %1969 = vperm.xlu0 %2455, %v1859_v5   ;;  %1954 = vperm.xlu1 %2456, %v1856_v57   ;;  %v1895_v3 = vmul.f32 %v1859_v5, %v3849_v20  ;;  %v1874_v20 = vld [vmem:[%s4061_s4 + $0x30] sm:$0xff]  ;;  %v1826_v5 = vadd.f32 1e-05, %v1790_v24 }
 0x22f   :  { %v1827_v45 = vadd.f32 1e-05, %v1791_v4  ;;  %v3908_v22 = vmul.f32 0.0051020407, %v1606_v36  ;;  %v1756_v26 = vmul.f32 0.0051020407, %v1729_v7  ;;  %v1858_v36 = vmul.f32 %v2638_v53, %v1804_v63 }
 0x230   :  { %v1913_v34 = vsub.f32 %v1877_v13, %v1895_v3  ;;  %v1910_v13 = vsub.f32 %v1874_v20, %v1892_v51  ;;  %v1774_v3 = vmul.f32 %v3911_v50, %v3911_v50 }
 0x231   :  { %2643 = vrsqrt.f32 %v1827_v45  ;;  %v1775_v57 = vmul.f32 %v3908_v22, %v3908_v22 }
 0x232   :  { %v1733_v55 = vpop.xlane.xlu1 %1732  ;;  %2095 = vperm.xlu0 %2455, %v1913_v34   ;;  %v1610_v15 = vpop.xlane.xlu0 %1609  ;;  %1959 = vperm.xlu1 %2456, %v1857_v0   ;;  %v1879_v34 = vld [vmem:[%s4061_s4 + $0x58] sm:$0xff]  ;;  %2645 = vrsqrt.f32 %v1826_v5  ;;  %v1792_v24 = vsub.f32 %v1756_v26, %v1774_v3  ;;  %v1806_v5 = vld [vmem:[%s4060_s3 + $0x50] sm:$0xff] }
 0x233   :  { %v2640_v29 = vpop.eup %2639  ;;  %v1757_v10 = vmul.f32 0.0051020407, %v1733_v55  ;;  %v3933_v63 = vmul.f32 0.0051020407, %v1610_v15 }
 0x234   :  { %v1861_v4 = vmul.f32 %v2640_v29, %v1807_v58  ;;  %v1894_v58 = vmul.f32 %v1858_v36, %v3852_v28  ;;  %v2642_v20 = vpop.eup %2641  ;;  %v1809_v29 = vld [vmem:[%s4060_s3 + $0x68] sm:$0xff] }
 0x235   :  { %v1793_v45 = vsub.f32 %v1757_v10, %v1775_v57  ;;  %v1828_v57 = vadd.f32 1e-05, %v1792_v24  ;;  %v1860_v3 = vmul.f32 %v2642_v20, %v1806_v5  ;;  %v1811_v20 = vld [vmem:[%s4060_s3 + $0x78] sm:$0xff] }
 0x236   :  { %1979 = vperm.xlu0 %2455, %v1861_v4   ;;  %2080 = vperm.xlu1 %2456, %v1910_v13   ;;  %v1614_v0 = vpop.xlane.xlu1 %1613  ;;  %v1897_v7 = vmul.f32 %v1861_v4, %v3871_v23  ;;  %v1737_v51 = vpop.xlane.xlu0 %1736  ;;  %v1876_v23 = vld [vmem:[%s4061_s4 + $0x40] sm:$0xff] }
 0x237   :  { %v1829_v27 = vadd.f32 1e-05, %v1793_v45  ;;  %v3930_v55 = vmul.f32 0.0051020407, %v1614_v0  ;;  %v1912_v13 = vsub.f32 %v1876_v23, %v1894_v58  ;;  %v1776_v45 = vmul.f32 %v3933_v63, %v3933_v63  ;;  %v1881_v0 = vld [vmem:[%s4061_s4 + $0x68] sm:$0xff] }
 0x238   :  { %v1915_v53 = vsub.f32 %v1879_v34, %v1897_v7 }
 0x239   :  { %2647 = vrsqrt.f32 %v1829_v27  ;;  %v1758_v27 = vmul.f32 0.0051020407, %v1737_v51  ;;  %v1777_v15 = vmul.f32 %v3930_v55, %v3930_v55 }
 0x23a   :  { %2105 = vperm.xlu0 %2455, %v1915_v53   ;;  %1964 = vperm.xlu1 %2456, %v1858_v36   ;;  %v1741_v26 = vpop.xlane.xlu1 %1740  ;;  %2649 = vrsqrt.f32 %v1828_v57  ;;  %v1896_v53 = vmul.f32 %v1860_v3, %v3873_v39  ;;  %v1883_v57 = vld [vmem:[%s4061_s4 + $0x78] sm:$0xff] }
 0x23b   :  { %v2644_v28 = vpop.eup %2643  ;;  %v1759_v10 = vmul.f32 0.0051020407, %v1741_v26  ;;  %v1794_v7 = vsub.f32 %v1758_v27, %v1776_v45  ;;  %v1810_v45 = vld [vmem:[%s4060_s3 + $0x70] sm:$0xff] }
 0x23c   :  { %v1863_v4 = vmul.f32 %v2644_v28, %v1809_v29  ;;  %v2646_v58 = vpop.eup %2645  ;;  %v1878_v29 = vld [vmem:[%s4061_s4 + $0x50] sm:$0xff] }
 0x23d   :  { %v1795_v34 = vsub.f32 %v1759_v10, %v1777_v15  ;;  %v1830_v5 = vadd.f32 1e-05, %v1794_v7  ;;  %v1914_v39 = vsub.f32 %v1878_v29, %v1896_v53 }
 0x23e   :  { %1989 = vperm.xlu0 %2455, %v1863_v4   ;;  %2090 = vperm.xlu1 %2456, %v1912_v13   ;;  %v1899_v36 = vmul.f32 %v1863_v4, %v3890_v32  ;;  %v1808_v32 = vld [vmem:[%s4060_s3 + $0x60] sm:$0xff] }
 0x23f   :  { %v1831_v24 = vadd.f32 1e-05, %v1795_v34  ;;  %v1862_v28 = vmul.f32 %v2646_v58, %v1808_v32  ;;  %v1880_v13 = vld [vmem:[%s4061_s4 + $0x60] sm:$0xff]  ;;  %v1882_v58 = vld [vmem:[%s4061_s4 + $0x70] sm:$0xff] }
 0x240   :  { %v1917_v51 = vsub.f32 %v1881_v0, %v1899_v36 }
 0x241   :  { %2651 = vrsqrt.f32 %v1831_v24  ;;  %v1898_v10 = vmul.f32 %v1862_v28, %v3892_v43  ;;  %v1885_v43 = vld [vmem:[%s4061_s4 + $0x88] sm:$0xff] }
 0x242   :  { %2115 = vperm.xlu0 %2455, %v1917_v51   ;;  %1974 = vperm.xlu1 %2456, %v1860_v3   ;;  %2653 = vrsqrt.f32 %v1830_v5  ;;  %v1813_v3 = vld [vmem:[%s4060_s3 + $0x88] sm:$0xff] }
 0x243   :  { %v2648_v23 = vpop.eup %2647  ;;  %v1916_v34 = vsub.f32 %v1880_v13, %v1898_v10 }
 0x244   :  { %v1865_v26 = vmul.f32 %v2648_v23, %v1811_v20  ;;  %v2650_v4 = vpop.eup %2649  ;;  %v1812_v20 = vld [vmem:[%s4060_s3 + $0x80] sm:$0xff]  ;;  %s2680_s3 = smov [#allocation2]  }
 0x245   :  { %v1864_v36 = vmul.f32 %v2650_v4, %v1810_v45 }
 0x246   :  { %1999 = vperm.xlu0 %2455, %v1865_v26   ;;  %2100 = vperm.xlu1 %2456, %v1914_v39   ;;  %v1901_v27 = vmul.f32 %v1865_v26, %v3908_v22 }
 0x247   :  { %v1900_v51 = vmul.f32 %v1864_v36, %v3911_v50  ;;  %v1884_v50 = vld [vmem:[%s4061_s4 + $0x80] sm:$0xff]  ;;  %s2215_s4 = sshll.u32 %s2680_s3, 4  ;;  %s2216_s4 = int_to_ptr.vmem [resolvable:$true] %s2215_s4 }
 0x248   :  { %v1919_v15 = vsub.f32 %v1883_v57, %v1901_v27  ;;  %s2655_s8 = scalar_lea.vmem %s2216_s4, 4608  ;;  %p2660_p1 = scmp.lt.s32.totalorder %s2216_s4, %s2216_s4 }
 0x249   :  { %v1918_v29 = vsub.f32 %v1882_v58, %v1900_v51  ;;  %p2656_p0 = scmp.ne.s32.totalorder %s2216_s4, %s2655_s8  ;;  %p2661_p2 = scmp.lt.s32.totalorder %s2655_s8, %s2655_s8 }
 0x24a   :  { %2125 = vperm.xlu0 %2455, %v1919_v15   ;;  %1984 = vperm.xlu1 %2456, %v1862_v28  }
 0x24b   :  { %v2652_v22 = vpop.eup %2651  ;;  %p2662_p3 = por %p2661_p2, %p2660_p1 }
 0x24c   :  { %v1867_v0 = vmul.f32 %v2652_v22, %v1813_v3  ;;  %v2654_v53 = vpop.eup %2653 }
 0x24d   :  { %v1866_v32 = vmul.f32 %v2654_v53, %v1812_v20  ;;  %p2663_p4 = pnand %p2662_p3, %p2656_p0 }
 0x24e   :  { %2110 = vperm.xlu1 %2456, %v1916_v34   ;;  %2009 = vperm.xlu0 %2455, %v1867_v0   ;;  %v1903_v7 = vmul.f32 %v1867_v0, %v3930_v55 }
 0x24f   :  { %v1902_v23 = vmul.f32 %v1866_v32, %v3933_v63 }
 0x250   :  { %v1921_v24 = vsub.f32 %v1885_v43, %v1903_v7 }
 0x251   :  { %v1920_v55 = vsub.f32 %v1884_v50, %v1902_v23 }
 0x252   :  { %1994 = vperm.xlu1 %2456, %v1864_v36   ;;  %2135 = vperm.xlu0 %2455, %v1921_v24  }
 0x256   :  { %2120 = vperm.xlu1 %2456, %v1918_v29  }
 0x25a   :  { %2004 = vperm.xlu1 %2456, %v1866_v32  }
 0x25e   :  { %2130 = vperm.xlu1 %2456, %v1920_v55  }
 0x28b   :  { %v1930_v5 = vpop.permute.xlu1 %1929 }
 0x28c   :  { %v2014_v39 = vmul.f32 %v3591_v11, %v1930_v5  ;;  %v2015_v28 = vmul.f32 %v3593_v37, %v1930_v5 }
 0x28d   :  { %v1925_v26 = vpop.permute.xlu0 %1924 }
 0x28e   :  { %v2012_v57 = vmul.f32 %v3587_v31, %v1925_v26  ;;  %v2013_v27 = vmul.f32 %v3589_v2, %v1925_v26 }
 0x291   :  { %v2056_v15 = vpop.permute.xlu0 %2055  ;;  %v2051_v10 = vpop.permute.xlu1 %2050 }
 0x292   :  { %v2140_v63 = vadd.f32 %v2056_v15, %v2014_v39  ;;  %v2141_v4 = vadd.f32 %v2056_v15, %v2015_v28  ;;  %v2138_v13 = vadd.f32 %v2051_v10, %v2012_v57  ;;  %v2139_v3 = vadd.f32 %v2051_v10, %v2013_v27 }
 0x294   :  { %2176 = vst [vmem:[#allocation2 + $0x10] sm:$0xff] %v2140_v63  ;;  %2177 = vst.msk [vmem:[#allocation2 + $0x18] sm:$0xff] %vm1542_vm1, %v2141_v4 }
 0x295   :  { %2174 = vst [vmem:[#allocation2] sm:$0xff] %v2138_v13  ;;  %2175 = vst.msk [vmem:[#allocation2 + $0x8] sm:$0xff] %vm1542_vm1, %v2139_v3  ;;  %v1935_v45 = vpop.permute.xlu1 %1934 }
 0x296   :  { %v2016_v2 = vmul.f32 %v3607_v47, %v1935_v45  ;;  %v2017_v34 = vmul.f32 %v3610_v52, %v1935_v45 }
 0x299   :  { %v1940_v11 = vpop.permute.xlu1 %1939  ;;  %v2066_v22 = vpop.permute.xlu0 %2065 }
 0x29a   :  { %v2018_v37 = vmul.f32 %v3613_v56, %v1940_v11  ;;  %v2019_v31 = vmul.f32 %v3617_v61, %v1940_v11 }
 0x29c   :  { %v2144_v0 = vadd.f32 %v2066_v22, %v2018_v37  ;;  %v2145_v36 = vadd.f32 %v2066_v22, %v2019_v31 }
 0x29d   :  { %v2061_v43 = vpop.permute.xlu1 %2060 }
 0x29e   :  { %2180 = vst [vmem:[#allocation2 + $0x30] sm:$0xff] %v2144_v0  ;;  %2181 = vst.msk [vmem:[#allocation2 + $0x38] sm:$0xff] %vm1542_vm1, %v2145_v36  ;;  %v2142_v7 = vadd.f32 %v2061_v43, %v2016_v2  ;;  %v2143_v24 = vadd.f32 %v2061_v43, %v2017_v34 }
 0x2a0   :  { %2178 = vst [vmem:[#allocation2 + $0x20] sm:$0xff] %v2142_v7  ;;  %2179 = vst.msk [vmem:[#allocation2 + $0x28] sm:$0xff] %vm1542_vm1, %v2143_v24 }
 0x2a1   :  { %v1945_v51 = vpop.permute.xlu1 %1944  ;;  %v2076_v56 = vpop.permute.xlu0 %2075 }
 0x2a2   :  { %v2020_v52 = vmul.f32 %v3631_v9, %v1945_v51  ;;  %v2021_v58 = vmul.f32 %v3634_v16, %v1945_v51 }
 0x2a5   :  { %v1950_v53 = vpop.permute.xlu1 %1949 }
 0x2a6   :  { %v2022_v61 = vmul.f32 %v3637_v19, %v1950_v53  ;;  %v2023_v47 = vmul.f32 %v3641_v1, %v1950_v53 }
 0x2a8   :  { %v2148_v20 = vadd.f32 %v2076_v56, %v2022_v61  ;;  %v2149_v29 = vadd.f32 %v2076_v56, %v2023_v47 }
 0x2a9   :  { %v2086_v32 = vpop.permute.xlu0 %2085  ;;  %v2071_v23 = vpop.permute.xlu1 %2070 }
 0x2aa   :  { %2184 = vst [vmem:[#allocation2 + $0x50] sm:$0xff] %v2148_v20  ;;  %2185 = vst.msk [vmem:[#allocation2 + $0x58] sm:$0xff] %vm1542_vm1, %v2149_v29  ;;  %v2146_v50 = vadd.f32 %v2071_v23, %v2020_v52  ;;  %v2147_v55 = vadd.f32 %v2071_v23, %v2021_v58 }
 0x2ac   :  { %2182 = vst [vmem:[#allocation2 + $0x40] sm:$0xff] %v2146_v50  ;;  %2183 = vst.msk [vmem:[#allocation2 + $0x48] sm:$0xff] %vm1542_vm1, %v2147_v55 }
 0x2ad   :  { %v1970_v5 = vpop.permute.xlu0 %1969  ;;  %v1955_v19 = vpop.permute.xlu1 %1954 }
 0x2ae   :  { %v2030_v1 = vmul.f32 %v3685_v12, %v1970_v5  ;;  %v2031_v9 = vmul.f32 %v3689_v18, %v1970_v5  ;;  %v2024_v15 = vmul.f32 %v3655_v35, %v1955_v19  ;;  %v2025_v10 = vmul.f32 %v3658_v40, %v1955_v19 }
 0x2b1   :  { %v2096_v26 = vpop.permute.xlu0 %2095  ;;  %v1960_v16 = vpop.permute.xlu1 %1959 }
 0x2b2   :  { %v2156_v39 = vadd.f32 %v2096_v26, %v2030_v1  ;;  %v2157_v28 = vadd.f32 %v2096_v26, %v2031_v9  ;;  %v2026_v57 = vmul.f32 %v3661_v44, %v1960_v16  ;;  %v2027_v27 = vmul.f32 %v3665_v49, %v1960_v16 }
 0x2b4   :  { %2192 = vst [vmem:[#allocation2 + $0x90] sm:$0xff] %v2156_v39  ;;  %2193 = vst.msk [vmem:[#allocation2 + $0x98] sm:$0xff] %vm1542_vm1, %v2157_v28  ;;  %v2152_v63 = vadd.f32 %v2086_v32, %v2026_v57  ;;  %v2153_v4 = vadd.f32 %v2086_v32, %v2027_v27  ;;  %v4065_v39 = vld [vmem:[#allocation5_spill] sm:$0xff] }
 0x2b5   :  { %v1980_v12 = vpop.permute.xlu0 %1979  ;;  %v2081_v13 = vpop.permute.xlu1 %2080 }
 0x2b6   :  { %2188 = vst [vmem:[#allocation2 + $0x70] sm:$0xff] %v2152_v63  ;;  %2189 = vst.msk [vmem:[#allocation2 + $0x78] sm:$0xff] %vm1542_vm1, %v2153_v4  ;;  %v2150_v18 = vadd.f32 %v2081_v13, %v2024_v15  ;;  %v2151_v3 = vadd.f32 %v2081_v13, %v2025_v10  ;;  %v2034_v44 = vmul.f32 %v3709_v42, %v1980_v12 }
 0x2b7   :  { %v2035_v49 = vmul.f32 %v3713_v48, %v1980_v12 }
 0x2b8   :  { %2186 = vst [vmem:[#allocation2 + $0x60] sm:$0xff] %v2150_v18  ;;  %2187 = vst.msk [vmem:[#allocation2 + $0x68] sm:$0xff] %vm1542_vm1, %v2151_v3 }
 0x2b9   :  { %v2106_v35 = vpop.permute.xlu0 %2105  ;;  %v1965_v40 = vpop.permute.xlu1 %1964 }
 0x2ba   :  { %v2160_v45 = vadd.f32 %v2106_v35, %v2034_v44  ;;  %v2161_v11 = vadd.f32 %v2106_v35, %v2035_v49  ;;  %v2028_v37 = vmul.f32 %v3679_v60, %v1965_v40  ;;  %v2029_v31 = vmul.f32 %v3682_v6, %v1965_v40 }
 0x2bc   :  { %2196 = vst [vmem:[#allocation2 + $0xb0] sm:$0xff] %v2160_v45  ;;  %2197 = vst.msk [vmem:[#allocation2 + $0xb8] sm:$0xff] %vm1542_vm1, %v2161_v11 }
 0x2bd   :  { %v1990_v22 = vpop.permute.xlu0 %1989  ;;  %v2091_v2 = vpop.permute.xlu1 %2090 }
 0x2be   :  { %v2154_v34 = vadd.f32 %v2091_v2, %v2028_v37  ;;  %v2155_v42 = vadd.f32 %v2091_v2, %v2029_v31  ;;  %v2038_v48 = vmul.f32 %v3733_v17, %v1990_v22  ;;  %v2039_v0 = vmul.f32 %v3737_v21, %v1990_v22 }
 0x2c0   :  { %2190 = vst [vmem:[#allocation2 + $0x80] sm:$0xff] %v2154_v34  ;;  %2191 = vst.msk [vmem:[#allocation2 + $0x88] sm:$0xff] %vm1542_vm1, %v2155_v42 }
 0x2c1   :  { %v2116_v36 = vpop.permute.xlu0 %2115  ;;  %v1975_v43 = vpop.permute.xlu1 %1974 }
 0x2c2   :  { %v2164_v7 = vadd.f32 %v2116_v36, %v2038_v48  ;;  %v2165_v24 = vadd.f32 %v2116_v36, %v2039_v0  ;;  %v2032_v60 = vmul.f32 %v3703_v30, %v1975_v43  ;;  %v2033_v6 = vmul.f32 %v3706_v14, %v1975_v43 }
 0x2c4   :  { %2200 = vst [vmem:[#allocation2 + $0xd0] sm:$0xff] %v2164_v7  ;;  %2201 = vst.msk [vmem:[#allocation2 + $0xd8] sm:$0xff] %vm1542_vm1, %v2165_v24 }
 0x2c5   :  { %v2000_v51 = vpop.permute.xlu0 %1999  ;;  %v2101_v56 = vpop.permute.xlu1 %2100 }
 0x2c6   :  { %v2158_v53 = vadd.f32 %v2101_v56, %v2032_v60  ;;  %v2159_v17 = vadd.f32 %v2101_v56, %v2033_v6  ;;  %v2042_v21 = vmul.f32 %v3757_v54, %v2000_v51  ;;  %v2043_v61 = vmul.f32 %v3761_v59, %v2000_v51 }
 0x2c8   :  { %2194 = vst [vmem:[#allocation2 + $0xa0] sm:$0xff] %v2158_v53  ;;  %2195 = vst.msk [vmem:[#allocation2 + $0xa8] sm:$0xff] %vm1542_vm1, %v2159_v17 }
 0x2c9   :  { %v2126_v47 = vpop.permute.xlu0 %2125  ;;  %v1985_v52 = vpop.permute.xlu1 %1984 }
 0x2ca   :  { %v2168_v58 = vadd.f32 %v2126_v47, %v2042_v21  ;;  %v2169_v20 = vadd.f32 %v2126_v47, %v2043_v61  ;;  %v2036_v30 = vmul.f32 %v3727_v62, %v1985_v52  ;;  %v2037_v14 = vmul.f32 %v3730_v8, %v1985_v52 }
 0x2cc   :  { %2204 = vst [vmem:[#allocation2 + $0xf0] sm:$0xff] %v2168_v58  ;;  %2205 = vst.msk [vmem:[#allocation2 + $0xf8] sm:$0xff] %vm1542_vm1, %v2169_v20 }
 0x2cd   :  { %v2010_v29 = vpop.permute.xlu0 %2009  ;;  %v2111_v32 = vpop.permute.xlu1 %2110 }
 0x2ce   :  { %v2162_v23 = vadd.f32 %v2111_v32, %v2036_v30  ;;  %v2163_v54 = vadd.f32 %v2111_v32, %v2037_v14  ;;  %v2046_v59 = vmul.f32 %v3781_v33, %v2010_v29  ;;  %v2047_v50 = vmul.f32 %v3785_v41, %v2010_v29 }
 0x2d0   :  { %2198 = vst [vmem:[#allocation2 + $0xc0] sm:$0xff] %v2162_v23  ;;  %2199 = vst.msk [vmem:[#allocation2 + $0xc8] sm:$0xff] %vm1542_vm1, %v2163_v54 }
 0x2d1   :  { %v2136_v55 = vpop.permute.xlu0 %2135  ;;  %v1995_v5 = vpop.permute.xlu1 %1994 }
 0x2d2   :  { %v2172_v19 = vadd.f32 %v2136_v55, %v2046_v59  ;;  %v2173_v1 = vadd.f32 %v2136_v55, %v2047_v50  ;;  %v2040_v62 = vmul.f32 %v3751_v38, %v1995_v5  ;;  %v2041_v8 = vmul.f32 %v3754_v46, %v1995_v5 }
 0x2d4   :  { %2208 = vst [vmem:[#allocation2 + $0x110] sm:$0xff] %v2172_v19  ;;  %2209 = vst.msk [vmem:[#allocation2 + $0x118] sm:$0xff] %vm1542_vm1, %v2173_v1 }
 0x2d5   :  { %v2121_v9 = vpop.permute.xlu1 %2120 }
 0x2d6   :  { %v2166_v26 = vadd.f32 %v2121_v9, %v2040_v62  ;;  %v2167_v16 = vadd.f32 %v2121_v9, %v2041_v8 }
 0x2d8   :  { %2202 = vst [vmem:[#allocation2 + $0xe0] sm:$0xff] %v2166_v26  ;;  %2203 = vst.msk [vmem:[#allocation2 + $0xe8] sm:$0xff] %vm1542_vm1, %v2167_v16 }
 0x2d9   :  { %v2005_v33 = vpop.permute.xlu1 %2004 }
 0x2da   :  { %v2044_v41 = vmul.f32 %v3775_v25, %v2005_v33  ;;  %v2045_v28 = vmul.f32 %v4065_v39, %v2005_v33 }
 0x2dd   :  { %v2131_v57 = vpop.permute.xlu1 %2130 }
 0x2de   :  { %v2170_v27 = vadd.f32 %v2131_v57, %v2044_v41  ;;  %v2171_v15 = vadd.f32 %v2131_v57, %v2045_v28 }
 0x2e0   :  { %2206 = vst [vmem:[#allocation2 + $0x100] sm:$0xff] %v2170_v27  ;;  %2207 = vst.msk [vmem:[#allocation2 + $0x108] sm:$0xff] %vm1542_vm1, %v2171_v15 }
 0x2e1   :  { %2666 = shalt.err (!%p2663_p4)
}
 0x2e2   :  { %s2667_s11 = scalar_lea.hbm %s4062_s5, 4608 }
 0x2e3   :  { %p2668_p5 = scmp.ne.s32.totalorder %s4062_s5, %s2667_s11  ;;  %p2671_p6 = scmp.lt.u32.totalorder %s2667_s11, %s4062_s5 }
 0x2e5   :  { %p2673_p7 = pnand %p2671_p6, %p2668_p5 }
 0x2e7   :  { %2676 = shalt.err (!%p2673_p7)
}
 0x2e8   :  { %s2681_s16 = smov 256   ;;  %s2682_s17 = smov 16  }
 0x2e9   :  { %2221 = dma.vmem_to_hbm [thread:$0]  %s2216_s4, 4608, %s4062_s5, [#allocation3], %s2681_s16, %s2681_s16, %s2682_s17  }
 0x2ea   :  { %2677 = dma.done.wait [#allocation3], 4608  }
 0x2eb   :  { %2678 = vsyncadd [#allocation3], 4294962688 }
 0x2ec   :  { %2225 = vsyncpa [#allocation3], 1 }

</bundles_post_ra>
